<compile_context>
chip_gen: v7x
topology: tpu7x:2x2x1
jax: 0.10.0
libtpu: 0.0.40
codegen_flags: <defaults>
</compile_context>

<pallas_src>
import functools

import jax
import jax.numpy as jnp
from jax import lax
from jax.experimental import pallas as pl
from jax.experimental.pallas import tpu as pltpu

LANE = 128


def _round_up(x, m):
    return (x + m - 1) // m * m


@functools.partial(jax.jit, static_argnames=("row_tile",))
def bottleneck_pallas(x_nhwc, w1, s1, b1, w2, s2, b2, w3, s3, b3, *,
                      row_tile=256):
    """x_nhwc: (N,H,W,Cin) f32; w1: (Cin,width); w2: (3,3,width,width)
    (kh,kw,in,out); w3: (width,Cout); s*/b*: (1,C) folded BN scale/bias (f32).
    Returns bf16 NHWC output."""
    N, H, W, Cin = x_nhwc.shape
    width = w1.shape[1]
    Cout = w3.shape[1]
    assert Cin == Cout, "identity shortcut requires inplanes == planes*expansion"

    Cp = _round_up(Cin, LANE)            # padded in/out channels (identity path)
    Wp = _round_up(width, LANE)          # padded bottleneck width
    L = H * W
    S = _round_up(W + 1, 16)             # halo rows each side (sublane aligned)
    TL = _round_up(min(row_tile, _round_up(L, 8)), 8)   # output rows per tile
    T = (L + TL - 1) // TL               # number of row tiles
    Lp = T * TL                          # padded row count
    TW = TL + 2 * S                      # stage-1 window rows per tile

    def pad2(a, r, c):
        return jnp.pad(a, ((0, r - a.shape[0]), (0, c - a.shape[1])))

    # Weights -> bf16, channel-padded, lane-dense.
    w1p = pad2(w1, Cp, Wp).astype(jnp.bfloat16)
    w2p = jnp.pad(w2, ((0, 0), (0, 0), (0, Wp - width), (0, Wp - width)))
    w2p = w2p.reshape(9, Wp, Wp).astype(jnp.bfloat16)
    w3p = pad2(w3, Wp, Cp).astype(jnp.bfloat16)
    # Folded BN scale/bias stay f32 (zero padding keeps padded channels at 0).
    s1p, b1p = pad2(s1, 1, Wp), pad2(b1, 1, Wp)
    s2p, b2p = pad2(s2, 1, Wp), pad2(b2, 1, Wp)
    s3p, b3p = pad2(s3, 1, Cp), pad2(b3, 1, Cp)

    # bf16 activations at the HBM boundary, with S zero rows of top/bottom halo
    # so every per-tile window load is in bounds (halo rows are re-zeroed by
    # the in-kernel row mask after bn1, which is what conv2's padding needs).
    x_flat = x_nhwc.reshape(N, L, Cin)
    xp = jnp.pad(x_flat, ((0, 0), (S, S + Lp - L),
                          (0, Cp - Cin))).astype(jnp.bfloat16)

    params = (w1p, s1p, b1p, w2p, s2p, b2p, w3p, s3p, b3p)

    def kernel(x_ref, w1_ref, s1_ref, b1_ref, w2_ref, s2_ref, b2_ref,
               w3_ref, s3_ref, b3_ref, out_ref, h_ref):
        t = pl.program_id(1)
        row0 = pl.multiple_of(t * TL, 8)       # window start (padded row coords)

        # ---- Stage 1: conv1 (1x1) + bn1 + relu over the halo window. ----
        xw = x_ref[0, pl.ds(row0, TW), :]                       # (TW, Cp) bf16
        h1 = jnp.dot(xw, w1_ref[...], preferred_element_type=jnp.float32)
        h1 = jnp.maximum(h1 * s1_ref[...] + b1_ref[...], 0.0)
        # Zero rows outside the image so conv2's H-boundary padding is exact.
        lrow = row0 - S + lax.broadcasted_iota(jnp.int32, (TW, 1), 0)
        h1 = jnp.where((lrow >= 0) & (lrow < L), h1, 0.0).astype(jnp.bfloat16)
        h_ref[...] = h1                                          # bf16 scratch

        # Column-validity masks for the W wrap-around of the flattened rows.
        col = (row0 + lax.broadcasted_iota(jnp.int32, (TL, 1), 0)) % W
        mask_l = col >= 1              # dx == 0 : source column c-1 exists
        mask_r = col <= W - 2          # dx == 2 : source column c+1 exists

        # ---- Stage 2: conv2 (3x3, pad=1) as 9 shifted slab matmuls. ----
        # Center tap (dy=1, dx=1): init the accumulator from the live h1
        # (no zero-fill, no scratch reload, no column mask needed).
        acc = jnp.dot(h1[S:S + TL, :], w2_ref[4],
                      preferred_element_type=jnp.float32)        # (TL, Wp) f32
        for dy in range(3):
            for dx in range(3):
                if dy == 1 and dx == 1:
                    continue
                off = (dy - 1) * W + (dx - 1)
                tap = h_ref[S + off:S + off + TL, :]             # (TL, Wp) bf16
                if dx == 0:
                    tap = jnp.where(mask_l, tap, jnp.zeros_like(tap))
                elif dx == 2:
                    tap = jnp.where(mask_r, tap, jnp.zeros_like(tap))
                acc = acc + jnp.dot(tap, w2_ref[dy * 3 + dx],
                                    preferred_element_type=jnp.float32)
        h2 = jnp.maximum(acc * s2_ref[...] + b2_ref[...], 0.0).astype(jnp.bfloat16)

        # ---- Stage 3: conv3 (1x1) + bn3 + residual + relu. ----
        h3 = jnp.dot(h2, w3_ref[...], preferred_element_type=jnp.float32)
        h3 = h3 * s3_ref[...] + b3_ref[...]
        # Re-read the residual rows from the resident input block (keeps no
        # large value live across the conv2/conv3 body).
        xr = x_ref[0, pl.ds(pl.multiple_of(row0 + S, 8), TL), :]  # (TL, Cp) bf16
        out_ref[0] = jnp.maximum(h3 + xr.astype(jnp.float32),
                                 0.0).astype(out_ref.dtype)

    def full_spec(a):
        return pl.BlockSpec(a.shape, lambda n, t, r=a.ndim: (0,) * r)

    out = pl.pallas_call(
        kernel,
        out_shape=jax.ShapeDtypeStruct((N, Lp, Cp), jnp.bfloat16),
        grid=(N, T),
        in_specs=[pl.BlockSpec((1, S + Lp + S, Cp), lambda n, t: (n, 0, 0))]
                 + [full_spec(p) for p in params],
        out_specs=pl.BlockSpec((1, TL, Cp), lambda n, t: (n, t, 0)),
        scratch_shapes=[pltpu.VMEM((TW, Wp), jnp.bfloat16)],
        compiler_params=pltpu.CompilerParams(
            dimension_semantics=("parallel", "parallel"),
            # <= physical VMEM on v5e/v6e/v7x; actual per-step footprint is
            # bounded by row_tile (a few MB), so this is pure headroom.
            vmem_limit_bytes=64 * 1024 * 1024),
    )(xp, *params)

    return out[:, :L, :Cout].reshape(N, H, W, Cout)


def fold_bn(gamma, beta, mean, var, eps=1e-5):
    scale = gamma / jnp.sqrt(var + eps)
    bias = beta - mean * scale
    return (scale.reshape(1, -1).astype(jnp.float32),
            bias.reshape(1, -1).astype(jnp.float32))


def reference_forward(x_nhwc, cw1, bn1, cw2, bn2, cw3, bn3, eps=1e-5):
    """Pure-JAX f32 reference (NHWC) of the eval-mode Bottleneck forward."""
    def bn(y, p):
        g, b, m, v = p
        return (y - m) / jnp.sqrt(v + eps) * g + b

    out = jnp.einsum('nhwc,dc->nhwd', x_nhwc, cw1[:, :, 0, 0])
    out = jax.nn.relu(bn(out, bn1))
    w2_hwio = jnp.transpose(cw2, (2, 3, 1, 0))
    out = jax.lax.conv_general_dilated(
        out, w2_hwio, window_strides=(1, 1), padding='SAME',
        dimension_numbers=('NHWC', 'HWIO', 'NHWC'))
    out = jax.nn.relu(bn(out, bn2))
    out = jnp.einsum('nhwc,dc->nhwd', out, cw3[:, :, 0, 0])
    out = bn(out, bn3)
    return jax.nn.relu(out + x_nhwc)


if __name__ == "__main__":
    # Small shapes consistent with Bottleneck: inplanes = planes * expansion so
    # the identity shortcut is valid with downsample=None, stride=1.
    N, H, W = 2, 8, 8
    inplanes, planes = 16, 4
    width = int(planes * (64 / 64.0)) * 1          # groups=1, base_width=64
    cout = planes * 4                              # expansion = 4

    key = jax.random.PRNGKey(0)
    ks = jax.random.split(key, 16)

    # Input in PyTorch NCHW, transposed to NHWC for the kernel.
    x_nchw = jax.random.normal(ks[0], (N, inplanes, H, W), dtype=jnp.float32)
    x_nhwc = jnp.transpose(x_nchw, (0, 2, 3, 1))

    # Conv weights in PyTorch OIHW layout, no bias.
    cw1 = 0.1 * jax.random.normal(ks[1], (width, inplanes, 1, 1), jnp.float32)
    cw2 = 0.1 * jax.random.normal(ks[2], (width, width, 3, 3), jnp.float32)
    cw3 = 0.1 * jax.random.normal(ks[3], (cout, width, 1, 1), jnp.float32)

    def bn_params(kg, kb, km, kv, c):
        gamma = jax.random.uniform(kg, (c,), jnp.float32, 0.5, 1.5)
        beta = 0.1 * jax.random.normal(kb, (c,), jnp.float32)
        mean = 0.1 * jax.random.normal(km, (c,), jnp.float32)
        var = jax.random.uniform(kv, (c,), jnp.float32, 0.5, 1.5)
        return gamma, beta, mean, var

    bn1 = bn_params(ks[4], ks[5], ks[6], ks[7], width)
    bn2 = bn_params(ks[8], ks[9], ks[10], ks[11], width)
    bn3 = bn_params(ks[12], ks[13], ks[14], ks[15], cout)

    # Convert weights to kernel layouts and fold BN (inference folding).
    w1 = jnp.transpose(cw1[:, :, 0, 0])            # (Cin, width)
    w2 = jnp.transpose(cw2, (2, 3, 1, 0))          # (3, 3, in, out)
    w3 = jnp.transpose(cw3[:, :, 0, 0])            # (width, Cout)
    s1, b1 = fold_bn(*bn1)
    s2, b2 = fold_bn(*bn2)
    s3, b3 = fold_bn(*bn3)

    # row_tile=32 -> 2 row tiles at H*W=64, exercising the halo/tiling path.
    out = bottleneck_pallas(x_nhwc, w1, s1, b1, w2, s2, b2, w3, s3, b3,
                            row_tile=32)
    out = jax.block_until_ready(out)

    ref = reference_forward(x_nhwc, cw1, bn1, cw2, bn2, cw3, bn3)
    assert out.shape == (N, H, W, cout)
    assert out.dtype == jnp.bfloat16
    # bf16 activations at the HBM boundary + bf16 MXU inputs with f32
    # accumulation -> compare against the pure-f32 reference with a
    # bf16-appropriate tolerance.
    out_f32 = out.astype(jnp.float32)
    err = float(jnp.max(jnp.abs(out_f32 - ref)))
    assert jnp.allclose(out_f32, ref, atol=3e-2, rtol=3e-2), f"max err {err}"

    print("KERNEL_OK")
</pallas_src>

<mosaic_0001>
module attributes {stable_mosaic.version = 11 : i64} {
  func.func @kernel(%arg0: i32, %arg1: i32, %arg2: memref<1x96x128xbf16, #tpu.memory_space<vmem>>, %arg3: memref<128x128xbf16, #tpu.memory_space<vmem>>, %arg4: memref<1x128xf32, #tpu.memory_space<vmem>>, %arg5: memref<1x128xf32, #tpu.memory_space<vmem>>, %arg6: memref<9x128x128xbf16, #tpu.memory_space<vmem>>, %arg7: memref<1x128xf32, #tpu.memory_space<vmem>>, %arg8: memref<1x128xf32, #tpu.memory_space<vmem>>, %arg9: memref<128x128xbf16, #tpu.memory_space<vmem>>, %arg10: memref<1x128xf32, #tpu.memory_space<vmem>>, %arg11: memref<1x128xf32, #tpu.memory_space<vmem>>, %arg12: memref<1x32x128xbf16, #tpu.memory_space<vmem>>, %arg13: memref<64x128xbf16, #tpu.memory_space<vmem>>) attributes {dimension_semantics = [#tpu.dimension_semantics<parallel>, #tpu.dimension_semantics<parallel>], iteration_bounds = array<i64: 2, 2>, scalar_prefetch = 0 : i64, scratch_operands = 1 : i64, tpu.core_type = #tpu.core_type<tc>, window_params = [{transform_indices = @transform_0, window_bounds = array<i64: 1, 96, 128>}, {pipeline_mode = #tpu.pipeline_mode<synchronous>, transform_indices = @transform_1, window_bounds = array<i64: 128, 128>}, {pipeline_mode = #tpu.pipeline_mode<synchronous>, transform_indices = @transform_2, window_bounds = array<i64: 1, 128>}, {pipeline_mode = #tpu.pipeline_mode<synchronous>, transform_indices = @transform_3, window_bounds = array<i64: 1, 128>}, {pipeline_mode = #tpu.pipeline_mode<synchronous>, transform_indices = @transform_4, window_bounds = array<i64: 9, 128, 128>}, {pipeline_mode = #tpu.pipeline_mode<synchronous>, transform_indices = @transform_5, window_bounds = array<i64: 1, 128>}, {pipeline_mode = #tpu.pipeline_mode<synchronous>, transform_indices = @transform_6, window_bounds = array<i64: 1, 128>}, {pipeline_mode = #tpu.pipeline_mode<synchronous>, transform_indices = @transform_7, window_bounds = array<i64: 128, 128>}, {pipeline_mode = #tpu.pipeline_mode<synchronous>, transform_indices = @transform_8, window_bounds = array<i64: 1, 128>}, {pipeline_mode = #tpu.pipeline_mode<synchronous>, transform_indices = @transform_9, window_bounds = array<i64: 1, 128>}, {transform_indices = @transform_10, window_bounds = array<i64: 1, 32, 128>}]} {
    %c32_i32 = arith.constant 32 : i32
    %0 = arith.muli %arg1, %c32_i32 : i32
    %1 = tpu.assume_multiple %0, 8 : i32
    %c0 = arith.constant 0 : index
    %2 = arith.index_cast %1 : i32 to index
    %c0_0 = arith.constant 0 : index
    %3 = vector.load %arg2[%c0, %2, %c0_0] : memref<1x96x128xbf16, #tpu.memory_space<vmem>>, vector<1x64x128xbf16>
    %4 = vector.shape_cast %3 : vector<1x64x128xbf16> to vector<64x128xbf16>
    %c0_1 = arith.constant 0 : index
    %c0_2 = arith.constant 0 : index
    %5 = vector.load %arg3[%c0_1, %c0_2] : memref<128x128xbf16, #tpu.memory_space<vmem>>, vector<128x128xbf16>
    %cst = arith.constant dense<0.000000e+00> : vector<64x128xf32>
    %6 = tpu.matmul %4, %5, %cst {dimension_numbers = #tpu.dot_dimension_numbers<[1], [0], [0], [1], [0, 0, 1, 1], [], []>} : vector<64x128xbf16>, vector<128x128xbf16>, vector<64x128xf32> -> vector<64x128xf32>
    %c0_3 = arith.constant 0 : index
    %c0_4 = arith.constant 0 : index
    %7 = vector.load %arg4[%c0_3, %c0_4] : memref<1x128xf32, #tpu.memory_space<vmem>>, vector<1x128xf32>
    %8 = vector.broadcast %7 : vector<1x128xf32> to vector<64x128xf32>
    %9 = arith.mulf %6, %8 : vector<64x128xf32>
    %c0_5 = arith.constant 0 : index
    %c0_6 = arith.constant 0 : index
    %10 = vector.load %arg5[%c0_5, %c0_6] : memref<1x128xf32, #tpu.memory_space<vmem>>, vector<1x128xf32>
    %11 = vector.broadcast %10 : vector<1x128xf32> to vector<64x128xf32>
    %12 = arith.addf %9, %11 : vector<64x128xf32>
    %cst_7 = arith.constant 0.000000e+00 : f32
    %13 = vector.broadcast %cst_7 : f32 to vector<64x128xf32>
    %14 = arith.maximumf %12, %13 : vector<64x128xf32>
    %c16_i32 = arith.constant 16 : i32
    %15 = arith.subi %1, %c16_i32 : i32
    %16 = tpu.iota {dimensions = array<i32: 0>} : vector<64x1xi32>
    %17 = vector.broadcast %15 : i32 to vector<64x1xi32>
    %18 = arith.addi %17, %16 : vector<64x1xi32>
    %c0_i32 = arith.constant 0 : i32
    %19 = vector.broadcast %c0_i32 : i32 to vector<64x1xi32>
    %20 = arith.cmpi sge, %18, %19 : vector<64x1xi32>
    %c64_i32 = arith.constant 64 : i32
    %21 = vector.broadcast %c64_i32 : i32 to vector<64x1xi32>
    %22 = arith.cmpi slt, %18, %21 : vector<64x1xi32>
    %23 = arith.andi %20, %22 : vector<64x1xi1>
    %cst_8 = arith.constant 0.000000e+00 : f32
    %24 = vector.shape_cast %23 : vector<64x1xi1> to vector<64x1xi1>
    %25 = vector.broadcast %24 : vector<64x1xi1> to vector<64x128xi1>
    %26 = vector.broadcast %cst_8 : f32 to vector<64x128xf32>
    %27 = arith.select %25, %14, %26 : vector<64x128xi1>, vector<64x128xf32>
    %28 = arith.truncf %27 : vector<64x128xf32> to vector<64x128xbf16>
    %c0_9 = arith.constant 0 : index
    %c0_10 = arith.constant 0 : index
    %29 = vector.load %arg13[%c0_9, %c0_10] : memref<64x128xbf16, #tpu.memory_space<vmem>>, vector<64x128xbf16>
    tpu.vector_store %arg13[%c0_9, %c0_10], %28 {strides = array<i32>} : memref<64x128xbf16, #tpu.memory_space<vmem>>, vector<64x128xbf16>,
    %30 = tpu.iota {dimensions = array<i32: 0>} : vector<32x1xi32>
    %31 = vector.broadcast %1 : i32 to vector<32x1xi32>
    %32 = arith.addi %31, %30 : vector<32x1xi32>
    %c8_i32 = arith.constant 8 : i32
    %c0_i32_11 = arith.constant 0 : i32
    %33 = arith.cmpi eq, %c8_i32, %c0_i32_11 : i32
    %c1_i32 = arith.constant 1 : i32
    %34 = arith.select %33, %c1_i32, %c8_i32 : i32
    %35 = vector.broadcast %34 : i32 to vector<32x1xi32>
    %36 = arith.remsi %32, %35 : vector<32x1xi32>
    %c0_i32_12 = arith.constant 0 : i32
    %37 = vector.broadcast %c0_i32_12 : i32 to vector<32x1xi32>
    %38 = arith.cmpi ne, %36, %37 : vector<32x1xi32>
    %c0_i32_13 = arith.constant 0 : i32
    %39 = vector.broadcast %c0_i32_13 : i32 to vector<32x1xi32>
    %40 = arith.cmpi slt, %36, %39 : vector<32x1xi32>
    %c0_i32_14 = arith.constant 0 : i32
    %41 = arith.cmpi slt, %34, %c0_i32_14 : i32
    %42 = vector.broadcast %41 : i1 to vector<32x1xi1>
    %43 = vector.broadcast %42 : vector<32x1xi1> to vector<32x1xi1>
    %44 = arith.xori %40, %43 : vector<32x1xi1>
    %45 = arith.andi %44, %38 : vector<32x1xi1>
    %46 = vector.broadcast %34 : i32 to vector<32x1xi32>
    %47 = arith.addi %36, %46 : vector<32x1xi32>
    %48 = arith.select %45, %47, %36 : vector<32x1xi1>, vector<32x1xi32>
    %c1_i32_15 = arith.constant 1 : i32
    %49 = vector.broadcast %c1_i32_15 : i32 to vector<32x1xi32>
    %50 = arith.cmpi sge, %48, %49 : vector<32x1xi32>
    %c6_i32 = arith.constant 6 : i32
    %51 = vector.broadcast %c6_i32 : i32 to vector<32x1xi32>
    %52 = arith.cmpi sle, %48, %51 : vector<32x1xi32>
    %53 = vector.extract_strided_slice %28 {offsets = [16, 0], sizes = [32, 128], strides = [1, 1]} : vector<64x128xbf16> to vector<32x128xbf16>
    %c4 = arith.constant 4 : index
    %c0_16 = arith.constant 0 : index
    %c0_17 = arith.constant 0 : index
    %54 = vector.load %arg6[%c4, %c0_16, %c0_17] : memref<9x128x128xbf16, #tpu.memory_space<vmem>>, vector<1x128x128xbf16>
    %55 = vector.shape_cast %54 : vector<1x128x128xbf16> to vector<128x128xbf16>
    %cst_18 = arith.constant dense<0.000000e+00> : vector<32x128xf32>
    %56 = tpu.matmul %53, %55, %cst_18 {dimension_numbers = #tpu.dot_dimension_numbers<[1], [0], [0], [1], [0, 0, 1, 1], [], []>} : vector<32x128xbf16>, vector<128x128xbf16>, vector<32x128xf32> -> vector<32x128xf32>
    %c7 = arith.constant 7 : index
    %c0_19 = arith.constant 0 : index
    %57 = vector.load %arg13[%c7, %c0_19] : memref<64x128xbf16, #tpu.memory_space<vmem>>, vector<32x128xbf16>
    %cst_20 = arith.constant 0.000000e+00 : bf16
    %58 = vector.broadcast %cst_20 : bf16 to vector<32x128xbf16>
    %59 = vector.shape_cast %50 : vector<32x1xi1> to vector<32x1xi1>
    %60 = vector.broadcast %59 : vector<32x1xi1> to vector<32x128xi1>
    %61 = arith.select %60, %57, %58 : vector<32x128xi1>, vector<32x128xbf16>
    %c0_21 = arith.constant 0 : index
    %c0_22 = arith.constant 0 : index
    %c0_23 = arith.constant 0 : index
    %62 = vector.load %arg6[%c0_21, %c0_22, %c0_23] : memref<9x128x128xbf16, #tpu.memory_space<vmem>>, vector<1x128x128xbf16>
    %63 = vector.shape_cast %62 : vector<1x128x128xbf16> to vector<128x128xbf16>
    %cst_24 = arith.constant dense<0.000000e+00> : vector<32x128xf32>
    %64 = tpu.matmul %61, %63, %cst_24 {dimension_numbers = #tpu.dot_dimension_numbers<[1], [0], [0], [1], [0, 0, 1, 1], [], []>} : vector<32x128xbf16>, vector<128x128xbf16>, vector<32x128xf32> -> vector<32x128xf32>
    %65 = arith.addf %56, %64 : vector<32x128xf32>
    %c8 = arith.constant 8 : index
    %c0_25 = arith.constant 0 : index
    %66 = vector.load %arg13[%c8, %c0_25] : memref<64x128xbf16, #tpu.memory_space<vmem>>, vector<32x128xbf16>
    %c1 = arith.constant 1 : index
    %c0_26 = arith.constant 0 : index
    %c0_27 = arith.constant 0 : index
    %67 = vector.load %arg6[%c1, %c0_26, %c0_27] : memref<9x128x128xbf16, #tpu.memory_space<vmem>>, vector<1x128x128xbf16>
    %68 = vector.shape_cast %67 : vector<1x128x128xbf16> to vector<128x128xbf16>
    %cst_28 = arith.constant dense<0.000000e+00> : vector<32x128xf32>
    %69 = tpu.matmul %66, %68, %cst_28 {dimension_numbers = #tpu.dot_dimension_numbers<[1], [0], [0], [1], [0, 0, 1, 1], [], []>} : vector<32x128xbf16>, vector<128x128xbf16>, vector<32x128xf32> -> vector<32x128xf32>
    %70 = arith.addf %65, %69 : vector<32x128xf32>
    %c9 = arith.constant 9 : index
    %c0_29 = arith.constant 0 : index
    %71 = vector.load %arg13[%c9, %c0_29] : memref<64x128xbf16, #tpu.memory_space<vmem>>, vector<32x128xbf16>
    %cst_30 = arith.constant 0.000000e+00 : bf16
    %72 = vector.broadcast %cst_30 : bf16 to vector<32x128xbf16>
    %73 = vector.shape_cast %52 : vector<32x1xi1> to vector<32x1xi1>
    %74 = vector.broadcast %73 : vector<32x1xi1> to vector<32x128xi1>
    %75 = arith.select %74, %71, %72 : vector<32x128xi1>, vector<32x128xbf16>
    %c2 = arith.constant 2 : index
    %c0_31 = arith.constant 0 : index
    %c0_32 = arith.constant 0 : index
    %76 = vector.load %arg6[%c2, %c0_31, %c0_32] : memref<9x128x128xbf16, #tpu.memory_space<vmem>>, vector<1x128x128xbf16>
    %77 = vector.shape_cast %76 : vector<1x128x128xbf16> to vector<128x128xbf16>
    %cst_33 = arith.constant dense<0.000000e+00> : vector<32x128xf32>
    %78 = tpu.matmul %75, %77, %cst_33 {dimension_numbers = #tpu.dot_dimension_numbers<[1], [0], [0], [1], [0, 0, 1, 1], [], []>} : vector<32x128xbf16>, vector<128x128xbf16>, vector<32x128xf32> -> vector<32x128xf32>
    %79 = arith.addf %70, %78 : vector<32x128xf32>
    %c15 = arith.constant 15 : index
    %c0_34 = arith.constant 0 : index
    %80 = vector.load %arg13[%c15, %c0_34] : memref<64x128xbf16, #tpu.memory_space<vmem>>, vector<32x128xbf16>
    %cst_35 = arith.constant 0.000000e+00 : bf16
    %81 = vector.broadcast %cst_35 : bf16 to vector<32x128xbf16>
    %82 = vector.shape_cast %50 : vector<32x1xi1> to vector<32x1xi1>
    %83 = vector.broadcast %82 : vector<32x1xi1> to vector<32x128xi1>
    %84 = arith.select %83, %80, %81 : vector<32x128xi1>, vector<32x128xbf16>
    %c3 = arith.constant 3 : index
    %c0_36 = arith.constant 0 : index
    %c0_37 = arith.constant 0 : index
    %85 = vector.load %arg6[%c3, %c0_36, %c0_37] : memref<9x128x128xbf16, #tpu.memory_space<vmem>>, vector<1x128x128xbf16>
    %86 = vector.shape_cast %85 : vector<1x128x128xbf16> to vector<128x128xbf16>
    %cst_38 = arith.constant dense<0.000000e+00> : vector<32x128xf32>
    %87 = tpu.matmul %84, %86, %cst_38 {dimension_numbers = #tpu.dot_dimension_numbers<[1], [0], [0], [1], [0, 0, 1, 1], [], []>} : vector<32x128xbf16>, vector<128x128xbf16>, vector<32x128xf32> -> vector<32x128xf32>
    %88 = arith.addf %79, %87 : vector<32x128xf32>
    %c17 = arith.constant 17 : index
    %c0_39 = arith.constant 0 : index
    %89 = vector.load %arg13[%c17, %c0_39] : memref<64x128xbf16, #tpu.memory_space<vmem>>, vector<32x128xbf16>
    %cst_40 = arith.constant 0.000000e+00 : bf16
    %90 = vector.broadcast %cst_40 : bf16 to vector<32x128xbf16>
    %91 = vector.shape_cast %52 : vector<32x1xi1> to vector<32x1xi1>
    %92 = vector.broadcast %91 : vector<32x1xi1> to vector<32x128xi1>
    %93 = arith.select %92, %89, %90 : vector<32x128xi1>, vector<32x128xbf16>
    %c5 = arith.constant 5 : index
    %c0_41 = arith.constant 0 : index
    %c0_42 = arith.constant 0 : index
    %94 = vector.load %arg6[%c5, %c0_41, %c0_42] : memref<9x128x128xbf16, #tpu.memory_space<vmem>>, vector<1x128x128xbf16>
    %95 = vector.shape_cast %94 : vector<1x128x128xbf16> to vector<128x128xbf16>
    %cst_43 = arith.constant dense<0.000000e+00> : vector<32x128xf32>
    %96 = tpu.matmul %93, %95, %cst_43 {dimension_numbers = #tpu.dot_dimension_numbers<[1], [0], [0], [1], [0, 0, 1, 1], [], []>} : vector<32x128xbf16>, vector<128x128xbf16>, vector<32x128xf32> -> vector<32x128xf32>
    %97 = arith.addf %88, %96 : vector<32x128xf32>
    %c23 = arith.constant 23 : index
    %c0_44 = arith.constant 0 : index
    %98 = vector.load %arg13[%c23, %c0_44] : memref<64x128xbf16, #tpu.memory_space<vmem>>, vector<32x128xbf16>
    %cst_45 = arith.constant 0.000000e+00 : bf16
    %99 = vector.broadcast %cst_45 : bf16 to vector<32x128xbf16>
    %100 = vector.shape_cast %50 : vector<32x1xi1> to vector<32x1xi1>
    %101 = vector.broadcast %100 : vector<32x1xi1> to vector<32x128xi1>
    %102 = arith.select %101, %98, %99 : vector<32x128xi1>, vector<32x128xbf16>
    %c6 = arith.constant 6 : index
    %c0_46 = arith.constant 0 : index
    %c0_47 = arith.constant 0 : index
    %103 = vector.load %arg6[%c6, %c0_46, %c0_47] : memref<9x128x128xbf16, #tpu.memory_space<vmem>>, vector<1x128x128xbf16>
    %104 = vector.shape_cast %103 : vector<1x128x128xbf16> to vector<128x128xbf16>
    %cst_48 = arith.constant dense<0.000000e+00> : vector<32x128xf32>
    %105 = tpu.matmul %102, %104, %cst_48 {dimension_numbers = #tpu.dot_dimension_numbers<[1], [0], [0], [1], [0, 0, 1, 1], [], []>} : vector<32x128xbf16>, vector<128x128xbf16>, vector<32x128xf32> -> vector<32x128xf32>
    %106 = arith.addf %97, %105 : vector<32x128xf32>
    %c24 = arith.constant 24 : index
    %c0_49 = arith.constant 0 : index
    %107 = vector.load %arg13[%c24, %c0_49] : memref<64x128xbf16, #tpu.memory_space<vmem>>, vector<32x128xbf16>
    %c7_50 = arith.constant 7 : index
    %c0_51 = arith.constant 0 : index
    %c0_52 = arith.constant 0 : index
    %108 = vector.load %arg6[%c7_50, %c0_51, %c0_52] : memref<9x128x128xbf16, #tpu.memory_space<vmem>>, vector<1x128x128xbf16>
    %109 = vector.shape_cast %108 : vector<1x128x128xbf16> to vector<128x128xbf16>
    %cst_53 = arith.constant dense<0.000000e+00> : vector<32x128xf32>
    %110 = tpu.matmul %107, %109, %cst_53 {dimension_numbers = #tpu.dot_dimension_numbers<[1], [0], [0], [1], [0, 0, 1, 1], [], []>} : vector<32x128xbf16>, vector<128x128xbf16>, vector<32x128xf32> -> vector<32x128xf32>
    %111 = arith.addf %106, %110 : vector<32x128xf32>
    %c25 = arith.constant 25 : index
    %c0_54 = arith.constant 0 : index
    %112 = vector.load %arg13[%c25, %c0_54] : memref<64x128xbf16, #tpu.memory_space<vmem>>, vector<32x128xbf16>
    %cst_55 = arith.constant 0.000000e+00 : bf16
    %113 = vector.broadcast %cst_55 : bf16 to vector<32x128xbf16>
    %114 = vector.shape_cast %52 : vector<32x1xi1> to vector<32x1xi1>
    %115 = vector.broadcast %114 : vector<32x1xi1> to vector<32x128xi1>
    %116 = arith.select %115, %112, %113 : vector<32x128xi1>, vector<32x128xbf16>
    %c8_56 = arith.constant 8 : index
    %c0_57 = arith.constant 0 : index
    %c0_58 = arith.constant 0 : index
    %117 = vector.load %arg6[%c8_56, %c0_57, %c0_58] : memref<9x128x128xbf16, #tpu.memory_space<vmem>>, vector<1x128x128xbf16>
    %118 = vector.shape_cast %117 : vector<1x128x128xbf16> to vector<128x128xbf16>
    %cst_59 = arith.constant dense<0.000000e+00> : vector<32x128xf32>
    %119 = tpu.matmul %116, %118, %cst_59 {dimension_numbers = #tpu.dot_dimension_numbers<[1], [0], [0], [1], [0, 0, 1, 1], [], []>} : vector<32x128xbf16>, vector<128x128xbf16>, vector<32x128xf32> -> vector<32x128xf32>
    %120 = arith.addf %111, %119 : vector<32x128xf32>
    %c0_60 = arith.constant 0 : index
    %c0_61 = arith.constant 0 : index
    %121 = vector.load %arg7[%c0_60, %c0_61] : memref<1x128xf32, #tpu.memory_space<vmem>>, vector<1x128xf32>
    %122 = vector.broadcast %121 : vector<1x128xf32> to vector<32x128xf32>
    %123 = arith.mulf %120, %122 : vector<32x128xf32>
    %c0_62 = arith.constant 0 : index
    %c0_63 = arith.constant 0 : index
    %124 = vector.load %arg8[%c0_62, %c0_63] : memref<1x128xf32, #tpu.memory_space<vmem>>, vector<1x128xf32>
    %125 = vector.broadcast %124 : vector<1x128xf32> to vector<32x128xf32>
    %126 = arith.addf %123, %125 : vector<32x128xf32>
    %cst_64 = arith.constant 0.000000e+00 : f32
    %127 = vector.broadcast %cst_64 : f32 to vector<32x128xf32>
    %128 = arith.maximumf %126, %127 : vector<32x128xf32>
    %129 = arith.truncf %128 : vector<32x128xf32> to vector<32x128xbf16>
    %c0_65 = arith.constant 0 : index
    %c0_66 = arith.constant 0 : index
    %130 = vector.load %arg9[%c0_65, %c0_66] : memref<128x128xbf16, #tpu.memory_space<vmem>>, vector<128x128xbf16>
    %cst_67 = arith.constant dense<0.000000e+00> : vector<32x128xf32>
    %131 = tpu.matmul %129, %130, %cst_67 {dimension_numbers = #tpu.dot_dimension_numbers<[1], [0], [0], [1], [0, 0, 1, 1], [], []>} : vector<32x128xbf16>, vector<128x128xbf16>, vector<32x128xf32> -> vector<32x128xf32>
    %c0_68 = arith.constant 0 : index
    %c0_69 = arith.constant 0 : index
    %132 = vector.load %arg10[%c0_68, %c0_69] : memref<1x128xf32, #tpu.memory_space<vmem>>, vector<1x128xf32>
    %133 = vector.broadcast %132 : vector<1x128xf32> to vector<32x128xf32>
    %134 = arith.mulf %131, %133 : vector<32x128xf32>
    %c0_70 = arith.constant 0 : index
    %c0_71 = arith.constant 0 : index
    %135 = vector.load %arg11[%c0_70, %c0_71] : memref<1x128xf32, #tpu.memory_space<vmem>>, vector<1x128xf32>
    %136 = vector.broadcast %135 : vector<1x128xf32> to vector<32x128xf32>
    %137 = arith.addf %134, %136 : vector<32x128xf32>
    %c16_i32_72 = arith.constant 16 : i32
    %138 = arith.addi %1, %c16_i32_72 : i32
    %139 = tpu.assume_multiple %138, 8 : i32
    %c0_73 = arith.constant 0 : index
    %140 = arith.index_cast %139 : i32 to index
    %c0_74 = arith.constant 0 : index
    %141 = vector.load %arg2[%c0_73, %140, %c0_74] : memref<1x96x128xbf16, #tpu.memory_space<vmem>>, vector<1x32x128xbf16>
    %142 = vector.shape_cast %141 : vector<1x32x128xbf16> to vector<32x128xbf16>
    %143 = arith.extf %142 : vector<32x128xbf16> to vector<32x128xf32>
    %144 = arith.addf %137, %143 : vector<32x128xf32>
    %cst_75 = arith.constant 0.000000e+00 : f32
    %145 = vector.broadcast %cst_75 : f32 to vector<32x128xf32>
    %146 = arith.maximumf %144, %145 : vector<32x128xf32>
    %147 = arith.truncf %146 : vector<32x128xf32> to vector<32x128xbf16>
    %c0_76 = arith.constant 0 : index
    %c0_77 = arith.constant 0 : index
    %c0_78 = arith.constant 0 : index
    %148 = vector.load %arg12[%c0_76, %c0_77, %c0_78] : memref<1x32x128xbf16, #tpu.memory_space<vmem>>, vector<1x32x128xbf16>
    %149 = vector.shape_cast %148 : vector<1x32x128xbf16> to vector<32x128xbf16>
    %150 = vector.shape_cast %147 : vector<32x128xbf16> to vector<1x32x128xbf16>
    tpu.vector_store %arg12[%c0_76, %c0_77, %c0_78], %150 {strides = array<i32>} : memref<1x32x128xbf16, #tpu.memory_space<vmem>>, vector<1x32x128xbf16>,
    return
  }
  func.func @transform_0(%arg0: i32, %arg1: i32) -> (i32, i32, i32) {
    %c0_i32 = arith.constant 0 : i32
    %c0_i32_0 = arith.constant 0 : i32
    %c0_i32_1 = arith.constant 0 : i32
    return %arg0, %c0_i32, %c0_i32_0 : i32, i32, i32
  }
  func.func @transform_1(%arg0: i32, %arg1: i32) -> (i32, i32) {
    %c0_i32 = arith.constant 0 : i32
    %c0_i32_0 = arith.constant 0 : i32
    %c0_i32_1 = arith.constant 0 : i32
    return %c0_i32, %c0_i32_0 : i32, i32
  }
  func.func @transform_2(%arg0: i32, %arg1: i32) -> (i32, i32) {
    %c0_i32 = arith.constant 0 : i32
    %c0_i32_0 = arith.constant 0 : i32
    %c0_i32_1 = arith.constant 0 : i32
    return %c0_i32, %c0_i32_0 : i32, i32
  }
  func.func @transform_3(%arg0: i32, %arg1: i32) -> (i32, i32) {
    %c0_i32 = arith.constant 0 : i32
    %c0_i32_0 = arith.constant 0 : i32
    %c0_i32_1 = arith.constant 0 : i32
    return %c0_i32, %c0_i32_0 : i32, i32
  }
  func.func @transform_4(%arg0: i32, %arg1: i32) -> (i32, i32, i32) {
    %c0_i32 = arith.constant 0 : i32
    %c0_i32_0 = arith.constant 0 : i32
    %c0_i32_1 = arith.constant 0 : i32
    %c0_i32_2 = arith.constant 0 : i32
    return %c0_i32, %c0_i32_0, %c0_i32_1 : i32, i32, i32
  }
  func.func @transform_5(%arg0: i32, %arg1: i32) -> (i32, i32) {
    %c0_i32 = arith.constant 0 : i32
    %c0_i32_0 = arith.constant 0 : i32
    %c0_i32_1 = arith.constant 0 : i32
    return %c0_i32, %c0_i32_0 : i32, i32
  }
  func.func @transform_6(%arg0: i32, %arg1: i32) -> (i32, i32) {
    %c0_i32 = arith.constant 0 : i32
    %c0_i32_0 = arith.constant 0 : i32
    %c0_i32_1 = arith.constant 0 : i32
    return %c0_i32, %c0_i32_0 : i32, i32
  }
  func.func @transform_7(%arg0: i32, %arg1: i32) -> (i32, i32) {
    %c0_i32 = arith.constant 0 : i32
    %c0_i32_0 = arith.constant 0 : i32
    %c0_i32_1 = arith.constant 0 : i32
    return %c0_i32, %c0_i32_0 : i32, i32
  }
  func.func @transform_8(%arg0: i32, %arg1: i32) -> (i32, i32) {
    %c0_i32 = arith.constant 0 : i32
    %c0_i32_0 = arith.constant 0 : i32
    %c0_i32_1 = arith.constant 0 : i32
    return %c0_i32, %c0_i32_0 : i32, i32
  }
  func.func @transform_9(%arg0: i32, %arg1: i32) -> (i32, i32) {
    %c0_i32 = arith.constant 0 : i32
    %c0_i32_0 = arith.constant 0 : i32
    %c0_i32_1 = arith.constant 0 : i32
    return %c0_i32, %c0_i32_0 : i32, i32
  }
  func.func @transform_10(%arg0: i32, %arg1: i32) -> (i32, i32, i32) {
    %c0_i32 = arith.constant 0 : i32
    %c0_i32_0 = arith.constant 0 : i32
    return %arg0, %arg1, %c0_i32 : i32, i32, i32
  }
}

</mosaic_0001>

<bundles_post_ra>
// kernel: bottleneck_pallas.1
= control target key start
LH: loop header
LB: loop body
LE: loop exit
PB: predicated region body
PF: predicated region fallthrough
CT: control target
= control target key end

     0   :  { %s4767_s0 = inlined_call_operand.hbm [shape: bf16[2,96,128], index: 0, kind: input, shape index: {}]   ;;  %s4768_s1 = inlined_call_operand.hbm [shape: bf16[128,128], index: 1, kind: input, shape index: {}]   ;;  %s4769_s2 = inlined_call_operand.hbm [shape: f32[1,128], index: 2, kind: input, shape index: {}]   ;;  %s4770_s3 = inlined_call_operand.hbm [shape: f32[1,128], index: 3, kind: input, shape index: {}]   ;;  %s4771_s4 = inlined_call_operand.hbm [shape: bf16[9,128,128], index: 4, kind: input, shape index: {}]   ;;  %s4772_s5 = inlined_call_operand.hbm [shape: f32[1,128], index: 5, kind: input, shape index: {}]   ;;  %s4773_s6 = inlined_call_operand.hbm [shape: f32[1,128], index: 6, kind: input, shape index: {}]   ;;  %s4774_s7 = inlined_call_operand.hbm [shape: bf16[128,128], index: 7, kind: input, shape index: {}]   ;;  %s4775_s8 = inlined_call_operand.hbm [shape: f32[1,128], index: 8, kind: input, shape index: {}]   ;;  %s4776_s9 = inlined_call_operand.hbm [shape: f32[1,128], index: 9, kind: input, shape index: {}]   ;;  %s4777_s10 = inlined_call_operand.hbm [shape: bf16[2,64,128], index: 10, kind: output, shape index: {}]  }
   0x1   :  { %4800 = sst [smem:[#allocation35_spill]] %s4767_s0 }
   0x2   :  { %4801 = sst [smem:[#allocation36_spill]] %s4768_s1 }
   0x3   :  { %4802 = sst [smem:[#allocation37_spill]] %s4769_s2 }
   0x4   :  { %4803 = sst [smem:[#allocation38_spill]] %s4770_s3 }
   0x5   :  { %4804 = sst [smem:[#allocation39_spill]] %s4771_s4 }
   0x6   :  { %4805 = sst [smem:[#allocation40_spill]] %s4772_s5 }
   0x7   :  { %4806 = sst [smem:[#allocation41_spill]] %s4773_s6 }
   0x8   :  { %4807 = sst [smem:[#allocation42_spill]] %s4777_s10 }
   0x9   :  { %15 = vsyncpa [#allocation4], 0 }
   0xa   :  { %17 = vsyncpa [#allocation4 + $0x1], 0 }
   0xb   :  { %18 = vsyncpa [#allocation7], 0 }
   0xc   :  { %19 = vsyncpa [#allocation10], 0 }
   0xd   :  { %20 = vsyncpa [#allocation13], 0 }
   0xe   :  { %21 = vsyncpa [#allocation16], 0 }
   0xf   :  { %22 = vsyncpa [#allocation19], 0 }
  0x10   :  { %23 = vsyncpa [#allocation5], 0 }
  0x11   :  { %25 = vsyncpa [#allocation5 + $0x1], 0  ;;  %s3951_s13 = smov 0   ;;  %s3953_s14 = smov 0  }
  0x12   :  { %s3955_s15 = smov 0   ;;  %s3957_s16 = smov 0  }
  0x13   :  { %s3959_s17 = smov 0   ;;  %s3961_s18 = smov 0  }
  0x14   :  { %s3963_s19 = smov 0   ;;  %s3965_s20 = smov 0  }
  0x15   :  { %s3967_s21 = smov 0   ;;  %s3969_s22 = smov 0  }
  0x16   :  { %s3971_s23 = smov 0  }
  0x17 LB: > { %4808 = sst [smem:[#allocation28_spill]] %s3838_s13  ;;  %s4778_s24 = sadd.s32 4294967295, %s3878_s23   ;;  %s3878_s23 = sphi %s3971_s23, %s31_s23   ;;  %s3874_s22 = sphi %s3969_s22, %s4887_s22   ;;  %s3870_s21 = sphi %s3967_s21, %s4886_s21   ;;  %s3866_s20 = sphi %s3965_s20, %s4885_s20   ;;  %s3862_s19 = sphi %s3963_s19, %s4884_s19   ;;  %s3858_s18 = sphi %s3961_s18, %s4883_s18   ;;  %s3854_s17 = sphi %s3959_s17, %s4882_s17   ;;  %s3850_s16 = sphi %s3957_s16, %s4881_s16   ;;  %s3846_s15 = sphi %s3955_s15, %s4880_s15   ;;  %s3842_s14 = sphi %s3953_s14, %s4879_s14   ;;  %s3838_s13 = sphi %s3951_s13, %s4878_s13  }
  0x18   : > { %4809 = sst [smem:[#allocation29_spill]] %s3842_s14  ;;  %p2620_p0 = scmp.ge.s32.totalorder %s3878_s23, 1 }
  0x19   : > { %4810 = sst [smem:[#allocation30_spill]] %s3846_s15  ;;  %p4010_p1 = scmp.eq.s32.totalorder %s4778_s24, 0 }
  0x1a   : > { %4811 = sst [smem:[#allocation31_spill]] %s3862_s19  ;;  %p291_p2 = scmp.lt.s32.totalorder %s3878_s23, 5 }
  0x1b   : > { %4812 = sst [smem:[#allocation32_spill]] %s3866_s20  ;;  %s3880_s27 = smov [#allocation6]  }
  0x1c   : > { %s4813_s25 = scalar_select %p4010_p1, 1, 0 }
  0x1d   : > { %p4015_p3 = pnand %p2620_p0, %p291_p2  ;;  %s303_s28 = sshll.u32 %s3880_s27, 4  ;;  %s4019_s28 = int_to_ptr.vmem [resolvable:$true] %s303_s28 }
  0x1e   : > { %4814 = sst [smem:[#allocation33_spill]] %s4813_s25  ;;  %s3881_s30 = smov [#allocation9]  }
  0x1f   : > { %s4815_s26 = scalar_select %p4015_p3, 1, 0 }
  0x20   : > { %p3204_p4 = pneg %p4015_p3  ;;  %s328_s11 = sshll.u32 %s3881_s30, 4  ;;  %s4029_s11 = int_to_ptr.vmem [resolvable:$true] %s328_s11 }
  0x21   : > { %4816 = sst [smem:[#allocation34_spill]] %s4815_s26  ;;  %s3882_s12 = smov [#allocation12]  }
  0x22   : > { %p4025_p5 = pnand %p3204_p4, %p4010_p1  ;;  %s4031_s24 = sshll.u32 %s3882_s12, 4  ;;  %s353_s24 = int_to_ptr.vmem [resolvable:$true] %s4031_s24 }
  0x23   : > { %s4818_s1 = sld [smem:[#allocation36_spill]] }
  0x24   : > { %p4041_p7 = pneg %p4025_p5 }
  0x29   : > { %s3454_s27 = scalar_lea.hbm %s4818_s1, 1024 }
  0x2a   : > { %p3455_p6 = scmp.ne.s32.totalorder %s4818_s1, %s3454_s27  ;;  %p3461_p10 = scmp.lt.u32.totalorder %s3454_s27, %s4818_s1 }
  0x2c   : > { %p3457_p8 = pnand %p4041_p7, %p3455_p6 }
  0x2e   : > { %p3458_p9 = pneg %p3457_p8 }
  0x30   : > { %p3463_p11 = pnand %p3461_p10, %p3458_p9 }
  0x32   : > { %3466 = shalt.err (!%p3463_p11)
}
  0x33   : > { %s3467_s10 = scalar_lea.vmem %s4019_s28, 1024  ;;  %p3475_p2 = scmp.lt.s32.totalorder %s4019_s28, %s4019_s28 }
  0x34   : > { %p3468_p12 = scmp.ne.s32.totalorder %s4019_s28, %s3467_s10  ;;  %p3476_p4 = scmp.lt.s32.totalorder %s3467_s10, %s3467_s10 }
  0x36   : > { %p3470_p13 = pnand %p3468_p12, %p4041_p7  ;;  %p3477_p6 = por %p3476_p4, %p3475_p2 }
  0x38   : > { %p3471_p0 = pneg %p3470_p13 }
  0x3a   : > { %p3478_p8 = pnand %p3477_p6, %p3471_p0 }
  0x3c   : > { %3481 = shalt.err (!%p3478_p8)
}
  0x3d   : > { %s4791_s19 = smov 64   ;;  %s4793_s20 = smov 4  }
  0x3e   : > { %3207 = dma.hbm_to_vmem [thread:$0]  (!%p4025_p5), %s4818_s1, 1024, %s4019_s28, [#allocation7], %s4791_s19, %s4791_s19, %s4793_s20  }
  0x3f   : > { %s4820_s3 = sld [smem:[#allocation38_spill]] }
  0x45   : > { %s3482_s10 = scalar_lea.hbm %s4820_s3, 16 }
  0x46   : > { %p3483_p9 = scmp.ne.s32.totalorder %s4820_s3, %s3482_s10  ;;  %p3489_p12 = scmp.lt.u32.totalorder %s3482_s10, %s4820_s3 }
  0x48   : > { %p3485_p10 = pnand %p3483_p9, %p4041_p7 }
  0x4a   : > { %p3486_p11 = pneg %p3485_p10 }
  0x4c   : > { %p3491_p13 = pnand %p3489_p12, %p3486_p11 }
  0x4e   : > { %3494 = shalt.err (!%p3491_p13)
}
  0x4f   : > { %s3495_s28 = scalar_lea.vmem %s4029_s11, 16  ;;  %s3502_s13 = scalar_lea.vmem %s4029_s11, 32 }
  0x50   : > { %p3496_p0 = scmp.ne.s32.totalorder %s4029_s11, %s3495_s28  ;;  %p3503_p6 = scmp.lt.s32.totalorder %s4029_s11, %s4029_s11 }
  0x51   : > { %p3504_p8 = scmp.lt.s32.totalorder %s3502_s13, %s3495_s28 }
  0x52   : > { %p3498_p2 = pnand %p3496_p0, %p4041_p7 }
  0x53   : > { %p3505_p9 = por %p3504_p8, %p3503_p6 }
  0x54   : > { %p3499_p4 = pneg %p3498_p2 }
  0x56   : > { %p3506_p10 = pnand %p3505_p9, %p3499_p4 }
  0x58   : > { %3509 = shalt.err (!%p3506_p10)
}
  0x59   : > { %3213 = dma.hbm_to_vmem [thread:$0]  (!%p4025_p5), %s4820_s3, 16, %s4029_s11, [#allocation10]  }
  0x5a   : > { %s4821_s5 = sld [smem:[#allocation40_spill]] }
  0x60   : > { %s3510_s27 = scalar_lea.hbm %s4821_s5, 16 }
  0x61   : > { %p3511_p11 = scmp.ne.s32.totalorder %s4821_s5, %s3510_s27  ;;  %p3517_p0 = scmp.lt.u32.totalorder %s3510_s27, %s4821_s5 }
  0x63   : > { %p3513_p12 = pnand %p3511_p11, %p4041_p7 }
  0x65   : > { %p3514_p13 = pneg %p3513_p12 }
  0x67   : > { %p3519_p2 = pnand %p3517_p0, %p3514_p13 }
  0x69   : > { %3522 = shalt.err (!%p3519_p2)
}
  0x6a   : > { %s3523_s13 = scalar_lea.vmem %s353_s24, 16  ;;  %s3530_s11 = scalar_lea.vmem %s353_s24, 32 }
  0x6b   : > { %p3524_p4 = scmp.ne.s32.totalorder %s353_s24, %s3523_s13  ;;  %p3531_p9 = scmp.lt.s32.totalorder %s353_s24, %s353_s24 }
  0x6c   : > { %p3532_p10 = scmp.lt.s32.totalorder %s3530_s11, %s3523_s13 }
  0x6d   : > { %p3526_p6 = pnand %p3524_p4, %p4041_p7 }
  0x6e   : > { %p3533_p3 = por %p3532_p10, %p3531_p9 }
  0x6f   : > { %p3527_p8 = pneg %p3526_p6 }
  0x71   : > { %p3534_p1 = pnand %p3533_p3, %p3527_p8 }
  0x73   : > { %3537 = shalt.err (!%p3534_p1)
}
  0x74   : > { %3219 = dma.hbm_to_vmem [thread:$0]  (!%p4025_p5), %s4821_s5, 16, %s353_s24, [#allocation13]  }
  0x75   : > { %s3885_s25 = smov [#allocation15]   ;;  %s3886_s27 = smov [#allocation8]  }
  0x76   : > { %s373_s26 = sshll.u32 %s3885_s25, 4  ;;  %s317_s30 = sshll.u32 %s3886_s27, 4  ;;  %s374_s26 = int_to_ptr.vmem [resolvable:$true] %s373_s26  ;;  %s318_s30 = int_to_ptr.vmem [resolvable:$true] %s317_s30 }
  0x77   : > { %s3538_s28 = scalar_lea.hbm %s4774_s7, 1024 }
  0x78   : > { %p3539_p1 = scmp.ne.s32.totalorder %s4774_s7, %s3538_s28  ;;  %p3545_p12 = scmp.lt.u32.totalorder %s3538_s28, %s4774_s7 }
  0x7a   : > { %p3541_p3 = pnand %p3539_p1, %p4041_p7 }
  0x7c   : > { %p3542_p11 = pneg %p3541_p3 }
  0x7e   : > { %p3547_p13 = pnand %p3545_p12, %p3542_p11 }
  0x80   : > { %3550 = shalt.err (!%p3547_p13)
}
  0x81   : > { %s3551_s24 = scalar_lea.vmem %s374_s26, 1024  ;;  %p3559_p6 = scmp.lt.s32.totalorder %s374_s26, %s374_s26 }
  0x82   : > { %p3552_p0 = scmp.ne.s32.totalorder %s374_s26, %s3551_s24  ;;  %p3560_p8 = scmp.lt.s32.totalorder %s3551_s24, %s3551_s24 }
  0x84   : > { %p3554_p2 = pnand %p3552_p0, %p4041_p7  ;;  %p3561_p9 = por %p3560_p8, %p3559_p6 }
  0x86   : > { %p3555_p4 = pneg %p3554_p2 }
  0x88   : > { %p3562_p10 = pnand %p3561_p9, %p3555_p4 }
  0x8a   : > { %3565 = shalt.err (!%p3562_p10)
}
  0x8b   : > { %s4822_s15 = smov 64   ;;  %s4823_s2 = sld [smem:[#allocation37_spill]] }
  0x8c   : > { %3225 = dma.hbm_to_vmem [thread:$0]  (!%p4025_p5), %s4774_s7, 1024, %s374_s26, [#allocation16], %s4822_s15, %s4822_s15, %s4793_s20  }
  0x91   : > { %s3566_s10 = scalar_lea.hbm %s4823_s2, 16 }
  0x92   : > { %p3567_p1 = scmp.ne.s32.totalorder %s4823_s2, %s3566_s10  ;;  %p3573_p12 = scmp.lt.u32.totalorder %s3566_s10, %s4823_s2 }
  0x94   : > { %p3569_p3 = pnand %p3567_p1, %p4041_p7 }
  0x96   : > { %p3570_p11 = pneg %p3569_p3 }
  0x98   : > { %p3575_p13 = pnand %p3573_p12, %p3570_p11 }
  0x9a   : > { %3578 = shalt.err (!%p3575_p13)
}
  0x9b   : > { %s3579_s24 = scalar_lea.vmem %s318_s30, 16  ;;  %s3586_s26 = scalar_lea.vmem %s318_s30, 32 }
  0x9c   : > { %p3580_p0 = scmp.ne.s32.totalorder %s318_s30, %s3579_s24  ;;  %p3587_p6 = scmp.lt.s32.totalorder %s318_s30, %s318_s30 }
  0x9d   : > { %p3588_p8 = scmp.lt.s32.totalorder %s3586_s26, %s3579_s24 }
  0x9e   : > { %p3582_p2 = pnand %p3580_p0, %p4041_p7 }
  0x9f   : > { %p3589_p9 = por %p3588_p8, %p3587_p6 }
  0xa0   : > { %p3583_p4 = pneg %p3582_p2 }
  0xa2   : > { %p3590_p10 = pnand %p3589_p9, %p3583_p4 }
  0xa4   : > { %3593 = shalt.err (!%p3590_p10)
}
  0xa5   : > { %3210 = dma.hbm_to_vmem [thread:$0]  (!%p4025_p5), %s4823_s2, 16, %s318_s30, [#allocation7]  }
  0xa6   : > { %s3887_s27 = smov [#allocation11]   ;;  %s3888_s10 = smov [#allocation14]  }
  0xa7   : > { %s338_s12 = sshll.u32 %s3887_s27, 4  ;;  %s363_s28 = sshll.u32 %s3888_s10, 4  ;;  %s339_s12 = int_to_ptr.vmem [resolvable:$true] %s338_s12  ;;  %s364_s28 = int_to_ptr.vmem [resolvable:$true] %s363_s28 }
  0xa8   : > { %s4824_s4 = sld [smem:[#allocation39_spill]] }
  0xae   : > { %s3594_s14 = scalar_lea.hbm %s4824_s4, 9216 }
  0xaf   : > { %p3595_p1 = scmp.ne.s32.totalorder %s4824_s4, %s3594_s14  ;;  %p3601_p12 = scmp.lt.u32.totalorder %s3594_s14, %s4824_s4 }
  0xb1   : > { %p3597_p3 = pnand %p3595_p1, %p4041_p7 }
  0xb3   : > { %p3598_p11 = pneg %p3597_p3 }
  0xb5   : > { %p3603_p13 = pnand %p3601_p12, %p3598_p11 }
  0xb7   : > { %3606 = shalt.err (!%p3603_p13)
}
  0xb8   : > { %s3607_s30 = scalar_lea.vmem %s339_s12, 9216  ;;  %p3615_p6 = scmp.lt.s32.totalorder %s339_s12, %s339_s12 }
  0xb9   : > { %p3608_p0 = scmp.ne.s32.totalorder %s339_s12, %s3607_s30  ;;  %p3616_p8 = scmp.lt.s32.totalorder %s3607_s30, %s3607_s30 }
  0xbb   : > { %p3610_p2 = pnand %p3608_p0, %p4041_p7  ;;  %p3617_p9 = por %p3616_p8, %p3615_p6 }
  0xbd   : > { %p3611_p4 = pneg %p3610_p2 }
  0xbf   : > { %p3618_p10 = pnand %p3617_p9, %p3611_p4 }
  0xc1   : > { %3621 = shalt.err (!%p3618_p10)
}
  0xc2   : > { %s4825_s25 = smov 4   ;;  %s4826_s6 = sld [smem:[#allocation41_spill]] }
  0xc3   : > { %3216 = dma.hbm_to_vmem [thread:$0]  (!%p4025_p5), %s4824_s4, 9216, %s339_s12, [#allocation10], %s4822_s15, %s4822_s15, %s4825_s25  }
  0xc8   : > { %s3622_s11 = scalar_lea.hbm %s4826_s6, 16 }
  0xc9   : > { %p3623_p1 = scmp.ne.s32.totalorder %s4826_s6, %s3622_s11  ;;  %p3629_p12 = scmp.lt.u32.totalorder %s3622_s11, %s4826_s6 }
  0xcb   : > { %p3625_p3 = pnand %p3623_p1, %p4041_p7 }
  0xcd   : > { %p3626_p11 = pneg %p3625_p3 }
  0xcf   : > { %p3631_p13 = pnand %p3629_p12, %p3626_p11 }
  0xd1   : > { %3634 = shalt.err (!%p3631_p13)
}
  0xd2   : > { %s3635_s30 = scalar_lea.vmem %s364_s28, 16  ;;  %s3642_s12 = scalar_lea.vmem %s364_s28, 32 }
  0xd3   : > { %p3636_p0 = scmp.ne.s32.totalorder %s364_s28, %s3635_s30  ;;  %p3643_p6 = scmp.lt.s32.totalorder %s364_s28, %s364_s28 }
  0xd4   : > { %p3644_p8 = scmp.lt.s32.totalorder %s3642_s12, %s3635_s30 }
  0xd5   : > { %p3638_p2 = pnand %p3636_p0, %p4041_p7 }
  0xd6   : > { %p3645_p9 = por %p3644_p8, %p3643_p6 }
  0xd7   : > { %p3639_p4 = pneg %p3638_p2 }
  0xd9   : > { %p3646_p10 = pnand %p3645_p9, %p3639_p4 }
  0xdb   : > { %3649 = shalt.err (!%p3646_p10)
}
  0xdc   : > { %3222 = dma.hbm_to_vmem [thread:$0]  (!%p4025_p5), %s4826_s6, 16, %s364_s28, [#allocation13]  }
  0xdd   : > { %s3889_s10 = smov [#allocation17]   ;;  %s3890_s11 = smov [#allocation18]  }
  0xde   : > { %s387_s13 = sshll.u32 %s3889_s10, 4  ;;  %s398_s14 = sshll.u32 %s3890_s11, 4  ;;  %s388_s13 = int_to_ptr.vmem [resolvable:$true] %s387_s13  ;;  %s399_s14 = int_to_ptr.vmem [resolvable:$true] %s398_s14 }
  0xdf   : > { %s3650_s19 = scalar_lea.hbm %s4775_s8, 16 }
  0xe0   : > { %p3651_p1 = scmp.ne.s32.totalorder %s4775_s8, %s3650_s19  ;;  %p3657_p12 = scmp.lt.u32.totalorder %s3650_s19, %s4775_s8 }
  0xe2   : > { %p3653_p3 = pnand %p3651_p1, %p4041_p7 }
  0xe4   : > { %p3654_p11 = pneg %p3653_p3 }
  0xe6   : > { %p3659_p13 = pnand %p3657_p12, %p3654_p11 }
  0xe8   : > { %3662 = shalt.err (!%p3659_p13)
}
  0xe9   : > { %s3663_s28 = scalar_lea.vmem %s388_s13, 16  ;;  %s3670_s27 = scalar_lea.vmem %s388_s13, 32 }
  0xea   : > { %p3664_p0 = scmp.ne.s32.totalorder %s388_s13, %s3663_s28  ;;  %p3671_p6 = scmp.lt.s32.totalorder %s388_s13, %s388_s13 }
  0xeb   : > { %p3672_p8 = scmp.lt.s32.totalorder %s3670_s27, %s3663_s28 }
  0xec   : > { %p3666_p2 = pnand %p3664_p0, %p4041_p7 }
  0xed   : > { %p3673_p9 = por %p3672_p8, %p3671_p6 }
  0xee   : > { %p3667_p4 = pneg %p3666_p2 }
  0xf0   : > { %p3674_p10 = pnand %p3673_p9, %p3667_p4 }
  0xf2   : > { %3677 = shalt.err (!%p3674_p10)
}
  0xf3   : > { %3228 = dma.hbm_to_vmem [thread:$0]  (!%p4025_p5), %s4775_s8, 16, %s388_s13, [#allocation16]  }
  0xf4   : > { %s3678_s26 = scalar_lea.hbm %s4776_s9, 16 }
  0xf5   : > { %p3679_p1 = scmp.ne.s32.totalorder %s4776_s9, %s3678_s26  ;;  %p3685_p12 = scmp.lt.u32.totalorder %s3678_s26, %s4776_s9 }
  0xf7   : > { %p3681_p3 = pnand %p3679_p1, %p4041_p7 }
  0xf9   : > { %p3682_p11 = pneg %p3681_p3 }
  0xfb   : > { %p3687_p13 = pnand %p3685_p12, %p3682_p11 }
  0xfd   : > { %3690 = shalt.err (!%p3687_p13)
}
  0xfe   : > { %s3691_s28 = scalar_lea.vmem %s399_s14, 16  ;;  %s3698_s13 = scalar_lea.vmem %s399_s14, 32 }
  0xff   : > { %p3692_p0 = scmp.ne.s32.totalorder %s399_s14, %s3691_s28  ;;  %p3699_p6 = scmp.lt.s32.totalorder %s399_s14, %s399_s14 }
 0x100   : > { %p3700_p8 = scmp.lt.s32.totalorder %s3698_s13, %s3691_s28 }
 0x101   : > { %p3694_p2 = pnand %p3692_p0, %p4041_p7 }
 0x102   : > { %p3701_p9 = por %p3700_p8, %p3699_p6 }
 0x103   : > { %p3695_p4 = pneg %p3694_p2 }
 0x105   : > { %p3702_p10 = pnand %p3701_p9, %p3695_p4 }
 0x107   : > { %3705 = shalt.err (!%p3702_p10)
}
 0x108   : > { %s4827_s0 = sld [smem:[#allocation33_spill]]  ;;  %s4828_s11 = sld [smem:[#allocation30_spill]] }
 0x109   : > { %3231 = dma.hbm_to_vmem [thread:$0]  (!%p4025_p5), %s4776_s9, 16, %s399_s14, [#allocation19]  }
 0x10a   : > { %s2619_s1 = sadd.s32 4294967294, %s3878_s23   ;;  %s4829_s24 = sld [smem:[#allocation29_spill]] }
 0x10b   : > { %s40_s29 = sadd.s32 1, %s3870_s21  ;;  %s43_s26 = sadd.s32 1, %s3874_s22 }
 0x10c   : > { %p41_p7 = scmp.ge.s32.totalorder %s40_s29, 2  ;;  %s4830_s19 = sld [smem:[#allocation28_spill]] }
 0x10d   : > { %s50_s30 = sadd.s32 1, %s3858_s18  ;;  %p57_p1 = scmp.ne.s32.totalorder %s3858_s18, %s3854_s17 }
 0x10e   : > { %p58_p3 = scmp.eq.s32.totalorder %s3878_s23, 0  ;;  %s4889_s29 = smov (%p41_p7, %s40_s29), 0 }
 0x10f   : > { %s4891_s26 = smov (!%p41_p7, %s43_s26), %s3874_s22  ;;  %p63_p5 = scmp.ne.s32.totalorder %s3854_s17, %s3850_s16 }
 0x110   : > { %p4232_p11 = por %p58_p3, %p57_p1  ;;  %p45_p12 = scmp.ge.s32.totalorder %s4891_s26, 2 }
 0x111   : > { %s263_s12 = ssub.s32 %s3870_s21, %s4889_s29  ;;  %p4832_p13 = scmp.ne.s32.totalorder %s4827_s0, 0 }
 0x112   : > { %s267_s28 = sadd.s32 1, %s4828_s11  ;;  %s4893_s26 = smov (%p45_p12, %s4891_s26), 0 }
 0x113   : > { %p4242_p0 = por %p4832_p13, %p63_p5  ;;  %p277_p2 = scmp.ne.s32.totalorder %s4828_s11, %s4829_s24 }
 0x114   : > { %s4834_s13 = sadd.s32 4294967295, %s3878_s23   ;;  %s47_s27 = ssub.s32 %s3874_s22, %s4893_s26 }
 0x115   : > { %p278_p4 = scmp.eq.s32.totalorder %s4834_s13, 3  ;;  %p283_p6 = scmp.ne.s32.totalorder %s4829_s24, %s4830_s19 }
 0x116   : > { %p48_p8 = scmp.eq.s32.totalorder %s47_s27, 0  ;;  %s264_s16 = sor.u32 %s263_s12, %s47_s27 }
 0x117   : > { %p265_p9 = scmp.eq.s32.totalorder %s264_s16, 0  ;;  %p4257_p10 = por %p278_p4, %p277_p2 }
 0x118   : > { %s4262_s0 = scalar_select %p48_p8, %s3858_s18, %s50_s30  }
 0x119   : > { %s4835_s10 = scalar_select %p4257_p10, 1, 0 }
 0x11a   : > { %s4895_s11 = smov (!%p265_p9, %s4828_s11), %s267_s28  ;;  %p284_p7 = scmp.eq.s32.totalorder %s2619_s1, 3 }
 0x11b   : > { %p3249_p1 = scmp.lt.s32.totalorder %s3878_s23, 4  ;;  %s409_s2 = sand.u32 1, %s3858_s18  }
 0x11c   : > { %s3162_s3 = smul.u32 768, %s3874_s22  ;;  %p4270_p3 = por %p284_p7, %p283_p6 }
 0x11d   : > { %s3161_s24 = smul.u32 48, %s409_s2  ;;  %p4276_p5 = pnand %p3249_p1, %p4232_p11 }
 0x11e   : > { %s4836_s4 = scalar_select %p4270_p3, 1, 0 }
 0x11f   : > { %s4838_s30 = sld [smem:[#allocation35_spill]]  ;;  %s413_s1 = scalar_lea.vmem [#allocation3], %s3161_s24 }
 0x120   : > { %s420_s27 = sshll.u32 %s413_s1, 4  ;;  %s4287_s14 = scalar_lea.sflag [#allocation4], %s409_s2  ;;  %s4285_s27 = int_to_ptr.vmem [resolvable:$true] %s420_s27 }
 0x121   : > { %p3708_p12 = pneg %p4276_p5 }
 0x125   : > { %s4283_s28 = scalar_lea.hbm %s4838_s30, %s3162_s3  ;;  %s3711_s13 = scalar_lea.hbm %s4838_s30, 1536 }
 0x126   : > { %s3706_s16 = scalar_lea.hbm %s4283_s28, 768  ;;  %p3712_p4 = scmp.lt.u32.totalorder %s4283_s28, %s4838_s30 }
 0x127   : > { %p3707_p11 = scmp.ne.s32.totalorder %s4283_s28, %s3706_s16  ;;  %p3713_p6 = scmp.lt.u32.totalorder %s3711_s13, %s3706_s16 }
 0x128   : > { %p3715_p9 = scmp.lt.u32.totalorder %s3706_s16, %s4283_s28 }
 0x129   : > { %p3709_p13 = pnand %p3708_p12, %p3707_p11  ;;  %p3714_p8 = por %p3713_p6, %p3712_p4 }
 0x12b   : > { %p3710_p2 = pneg %p3709_p13  ;;  %p3716_p7 = por %p3715_p9, %p3714_p8 }
 0x12d   : > { %p3717_p1 = pnand %p3716_p7, %p3710_p2 }
 0x12f   : > { %3720 = shalt.err (!%p3717_p1)
}
 0x130   : > { %s3721_s2 = scalar_lea.vmem %s4285_s27, 768  ;;  %s3891_s24 = smov [#allocation3]  }
 0x131   : > { %p3722_p11 = scmp.ne.s32.totalorder %s4285_s27, %s3721_s2  ;;  %s3726_s1 = sshll.u32 %s3891_s24, 4  ;;  %s3727_s1 = int_to_ptr.vmem [resolvable:$false] %s3726_s1 }
 0x132   : > { %s3728_s5 = scalar_lea.vmem %s3727_s1, 1536  ;;  %p3729_p10 = scmp.lt.s32.totalorder %s4285_s27, %s3727_s1 }
 0x133   : > { %p3724_p13 = pnand %p3722_p11, %p3708_p12  ;;  %p3730_p4 = scmp.lt.s32.totalorder %s3728_s5, %s3721_s2 }
 0x135   : > { %p3725_p3 = pneg %p3724_p13  ;;  %p3731_p6 = por %p3730_p4, %p3729_p10 }
 0x137   : > { %p3732_p8 = pnand %p3731_p6, %p3725_p3 }
 0x139   : > { %3735 = shalt.err (!%p3732_p8)
}
 0x13a   : > { %3235 = dma.hbm_to_vmem [thread:$0]  (!%p4276_p5), %s4283_s28, 768, %s4285_s27, %s4287_s14, %s4822_s15, %s4822_s15, %s4825_s25  }
 0x13b   : > { %s4839_s6 = sld [smem:[#allocation34_spill]] }
 0x141   : > { %p4840_p12 = scmp.ne.s32.totalorder %s4839_s6, 0 }
 0x142   : > { %s434_s16 = sand.u32 (!%p4840_p12), 1, %s3854_s17  }
 0x143   : > { %432 = sbr.rel (%p4840_p12) target bundleno = 1256 (0x4e8), region = 60  ;;  %s435_s12 = scalar_lea.sflag (!%p4840_p12), [#allocation4], %s434_s16 }
 0x144   : > { %s4321_s3 = smul.u32 (!%p4840_p12), 48, %s434_s16 }
 0x146   : > { %s438_s13 = scalar_lea.vmem (!%p4840_p12), [#allocation3], %s4321_s3 }
 0x14a   : > { %3809 = dma.done.wait (%p4242_p0), %s435_s12, 768  }
 0x14b   : > { %3811 = vsyncadd (%p4242_p0), %s435_s12, 4294966528  ;;  %s4841_s19 = sld [smem:[#allocation33_spill]] }
 0x151   : > { %p4842_p10 = scmp.ne.s32.totalorder %s4841_s19, 0 }
 0x153   : > { %3813 = dma.done.wait (%p4842_p10), [#allocation7], 1040  }
 0x154   : > { %3815 = vsyncadd (%p4842_p10), [#allocation7], 4294966256 }
 0x155   : > { %3817 = dma.done.wait (%p4842_p10), [#allocation10], 9232  }
 0x156   : > { %3819 = vsyncadd (%p4842_p10), [#allocation10], 4294958064 }
 0x157   : > { %3821 = dma.done.wait (%p4842_p10), [#allocation13], 32  }
 0x158   : > { %3823 = vsyncadd (%p4842_p10), [#allocation13], 4294967264 }
 0x159   : > { %3825 = dma.done.wait (%p4842_p10), [#allocation16], 1040  }
 0x15a   : > { %3827 = vsyncadd (%p4842_p10), [#allocation16], 4294966256 }
 0x15b   : > { %3829 = dma.done.wait (%p4842_p10), [#allocation19], 16  }
 0x15c   : > { %3831 = vsyncadd (%p4842_p10), [#allocation19], 4294967280  ;;  %s4843_s15 = sld [smem:[#allocation31_spill]]  ;;  %v3362_v0 = vld [vmem:[#allocation6] sm:$0xff]   ;;  %v3363_v1 = vld [vmem:[#allocation6 + $0x8] sm:$0xff]   ;;  %v720_v30 = vlaneseq  ;;  %s4872_s2 = sld [smem:[#allocation29_spill]] }
 0x15d   : > { %2905 = vmatprep.subr.bf16.mxu0 %v3362_v0  ;;  %v3364_v2 = vld [vmem:[#allocation6 + $0x10] sm:$0xff]   ;;  %v3365_v3 = vld [vmem:[#allocation6 + $0x18] sm:$0xff]   ;;  %v3366_v5 = vld [vmem:[#allocation6 + $0x20] sm:$0xff]   ;;  %s4873_s16 = sld [smem:[#allocation32_spill]]  ;;  %p4875_p3 = scmp.ne.s32.totalorder %s4835_s10, 0 }
 0x15e   : > { %2906 = vmatpush3.bf16.msra.mxu0 %v3362_v0  ;;  %v3367_v6 = vld [vmem:[#allocation6 + $0x28] sm:$0xff]   ;;  %v3368_v7 = vld [vmem:[#allocation6 + $0x30] sm:$0xff]   ;;  %v3369_v8 = vld [vmem:[#allocation6 + $0x38] sm:$0xff]   ;;  %v4360_v31 = vshrl.u32 %v720_v30, 7 }
 0x15f   : > { %2907 = vmatprep.subr.bf16.mxu0 %v3363_v1  ;;  %v3374_v12 = vld [vmem:[#allocation11] sm:$0xff]   ;;  %v3376_v14 = vld [vmem:[#allocation11 + $0x8] sm:$0xff]   ;;  %v3378_v16 = vld [vmem:[#allocation11 + $0x10] sm:$0xff]  }
 0x160   : > { %v3375_v13 = vld [vmem:[#allocation11 + $0x80] sm:$0xff]   ;;  %v3377_v15 = vld [vmem:[#allocation11 + $0x88] sm:$0xff]   ;;  %v3379_v17 = vld [vmem:[#allocation11 + $0x90] sm:$0xff]   ;;  %v4363_v32 = vadd.s32 16, %v4360_v31  ;;  %v4367_v34 = vadd.s32 24, %v4360_v31  ;;  %v4370_v35 = vadd.s32 8, %v4360_v31 }
 0x161   : > { %2989 = vmatprep.subr.bf16.mxu1 %v3375_v13  ;;  %v3380_v18 = vld [vmem:[#allocation11 + $0x18] sm:$0xff]   ;;  %v3382_v20 = vld [vmem:[#allocation11 + $0x20] sm:$0xff]   ;;  %v3384_v22 = vld [vmem:[#allocation11 + $0x28] sm:$0xff]  }
 0x162   : > { %s4349_s25 = sshll.u32 %s4843_s15, 5  ;;  %2908 = vmatpush3.bf16.msra.mxu0 %v3363_v1  ;;  %2990 = vmatpush3.bf16.msra.mxu1 %v3375_v13  ;;  %v3381_v19 = vld [vmem:[#allocation11 + $0x98] sm:$0xff]   ;;  %v3383_v21 = vld [vmem:[#allocation11 + $0xa0] sm:$0xff]   ;;  %v3385_v23 = vld [vmem:[#allocation11 + $0xa8] sm:$0xff]   ;;  %s508_s12 = sand.u32 1, %s4872_s2  }
 0x163   : > { %s516_s20 = sshra.s32 %s4349_s25, 3  ;;  %2909 = vmatprep.subr.bf16.mxu0 %v3364_v2  ;;  %2991 = vmatprep.subr.bf16.mxu1 %v3377_v15  ;;  %v3386_v24 = vld [vmem:[#allocation11 + $0x30] sm:$0xff]   ;;  %v3388_v26 = vld [vmem:[#allocation11 + $0x38] sm:$0xff]   ;;  %v4354_v28 = vld [vmem:[#allocation11 + $0x100] sm:$0xff]   ;;  %v794_v33 = vstv %s4349_s25  ;;  %s2659_s14 = sadd.s32 4294967280, %s4349_s25 }
 0x164   : > { %s2644_s28 = sshll.u32 %s516_s20, 2  ;;  %v3387_v25 = vld [vmem:[#allocation11 + $0xb0] sm:$0xff]   ;;  %v3389_v27 = vld [vmem:[#allocation11 + $0xb8] sm:$0xff]   ;;  %v4356_v29 = vld [vmem:[#allocation11 + $0xc0] sm:$0xff]   ;;  %v797_v36 = vadd.s32 %v794_v33, %v4363_v32  ;;  %v798_v37 = vadd.s32 %v794_v33, %v4367_v34  ;;  %v795_v38 = vadd.s32 %v794_v33, %v4360_v31  ;;  %v796_v39 = vadd.s32 %v794_v33, %v4370_v35  ;;  %s2384_s24 = sadd.s32 16, %s4349_s25 }
 0x165   : > { %s519_s27 = scalar_lea.vmem %s438_s13, %s2644_s28 [#allocation3]  ;;  %s2385_s1 = sshra.s32 %s2384_s24, 3 }
 0x166   : > { %v3370_v4 = vld [vmem:[%s519_s27] sm:$0xff]   ;;  %2910 = vmatpush3.bf16.msra.mxu0 %v3364_v2  ;;  %v3371_v9 = vld [vmem:[%s519_s27 + $0x8] sm:$0xff]   ;;  %v3372_v10 = vld [vmem:[%s519_s27 + $0x10] sm:$0xff]   ;;  %2992 = vmatpush3.bf16.msra.mxu1 %v3377_v15  ;;  %v814_v40 = vsub.s32 0, %v797_v36  ;;  %v821_v41 = vsub.s32 0, %v798_v37  ;;  %v800_v42 = vsub.s32 0, %v795_v38  ;;  %v729_v15 = vstv %s2659_s14 }
 0x167   : > { %2921 = vmatprep.mubr.bf16.mxu0 %v3370_v4  ;;  %2911 = vmatprep.subr.bf16.mxu0 %v3365_v3  ;;  %v3373_v11 = vld [vmem:[%s519_s27 + $0x18] sm:$0xff]   ;;  %v807_v43 = vsub.s32 0, %v796_v39  ;;  %vm813_vm0 = vcmp.lt.s32.totalorder %v797_v36, 0  ;;  %vm820_vm1 = vcmp.lt.s32.totalorder %v798_v37, 0  ;;  %vm799_vm2 = vcmp.lt.s32.totalorder %v795_v38, 0  ;;  %s2758_s5 = sshll.u32 %s2385_s1, 2 }
 0x168   : > { %2993 = vmatprep.subr.bf16.mxu1 %v3379_v17  ;;  %v2662_v44 = vmin.u32 %v814_v40, %v797_v36  ;;  %v2663_v45 = vmin.u32 %v821_v41, %v798_v37  ;;  %v2660_v46 = vmin.u32 %v800_v42, %v795_v38  ;;  %vm806_vm3 = vcmp.lt.s32.totalorder %v796_v39, 0  ;;  %s2388_s6 = scalar_lea.vmem %s438_s13, %s2758_s5 [#allocation3]  ;;  %s2642_s19 = sshll.u32 %s508_s12, 4 }
 0x169   : > { %v2661_v47 = vmin.u32 %v807_v43, %v796_v39  ;;  %v3892_v4 = vmov 0   ;;  %v725_v36 = vadd.s32 32, %v4360_v31  ;;  %v733_v39 = vadd.s32 %v729_v15, %v4367_v34  ;;  %s2764_s3 = sshll.u32 %s4843_s15, 2  ;;  %s2765_s13 = sshll.u32 %s4873_s16, 3 }
 0x16a   : > { %2912 = vmatpush3.bf16.msra.mxu0 %v3365_v3  ;;  %2994 = vmatpush3.bf16.msra.mxu1 %v3379_v17  ;;  %v817_v48 = vand.u32 7, %v2662_v44  ;;  %v824_v49 = vand.u32 7, %v2663_v45  ;;  %v803_v50 = vand.u32 7, %v2660_v46  ;;  %v728_v40 = vadd.s32 56, %v4360_v31  ;;  %s2438_s25 = sadd.s32 %s2765_s13, %s2764_s3  ;;  %s510_s20 = scalar_lea.vmem [#allocation20], %s2642_s19 }
 0x16b   : > { %2913 = vmatprep.subr.bf16.mxu0 %v3366_v5  ;;  %2995 = vmatprep.subr.bf16.mxu1 %v3381_v19  ;;  %v810_v51 = vand.u32 7, %v2661_v47  ;;  %v731_v41 = vadd.s32 %v729_v15, %v4370_v35  ;;  %v4410_v47 = vld [vmem:[#allocation8] ss:$0 sm:$0xff]  ;;  %v4412_v34 = vadd.s32 %v729_v15, %v725_v36  ;;  %s2441_s28 = sshll.u32 %s510_s20, 4  ;;  %s2766_s27 = sshll.u32 %s2438_s25, 6  ;;  %s4697_s28 = int_to_ptr.vmem [resolvable:$true] %s2441_s28 }
 0x16c   : > { %v818_v52 = vsub.s32 0, %v817_v48  ;;  %v825_v53 = vsub.s32 0, %v824_v49  ;;  %v804_v54 = vsub.s32 0, %v803_v50  ;;  %s4874_s24 = sld [smem:[#allocation42_spill]]  ;;  %s4706_s5 = scalar_lea.sflag [#allocation5], %s508_s12 }
 0x16d   : > { %v811_v55 = vsub.s32 0, %v810_v51  ;;  %s3893_s16 = smov [#allocation20]  }
 0x16e   : > { %2914 = vmatpush3.bf16.msra.mxu0 %v3366_v5  ;;  %2996 = vmatpush3.bf16.msra.mxu1 %v3381_v19  ;;  %v819_v56 = vsel %vm813_vm0, %v818_v52, %v817_v48  ;;  %v826_v57 = vsel %vm820_vm1, %v825_v53, %v824_v49  ;;  %v805_v58 = vsel %vm799_vm2, %v804_v54, %v803_v50  ;;  %v726_v48 = vadd.s32 40, %v4360_v31  ;;  %v4419_v50 = vld [vmem:[#allocation9] ss:$0 sm:$0xff]  ;;  %s3740_s19 = sshll.u32 %s3893_s16, 4  ;;  %s3741_s19 = int_to_ptr.vmem [resolvable:$false] %s3740_s19 }
 0x16f   : > { %2915 = vmatprep.subr.bf16.mxu0 %v3367_v6  ;;  %2997 = vmatprep.subr.bf16.mxu1 %v3383_v21  ;;  %vm829_vm4 = vcmp.ne.s32.totalorder %v819_v56, 0  ;;  %vm833_vm5 = vcmp.lt.s32.totalorder %v819_v56, 0  ;;  %v812_v59 = vsel %vm806_vm3, %v811_v55, %v810_v51  ;;  %vm830_vm6 = vcmp.ne.s32.totalorder %v826_v57, 0  ;;  %s3742_s3 = scalar_lea.vmem %s3741_s19, 512  ;;  %p3743_p9 = scmp.lt.s32.totalorder %s4697_s28, %s3741_s19 }
 0x170   : > { %vm834_vm7 = vcmp.lt.s32.totalorder %v826_v57, 0  ;;  %v841_v60 = vadd.s32 8, %v819_v56  ;;  %vm827_vm8 = vcmp.ne.s32.totalorder %v805_v58, 0  ;;  %vm831_vm9 = vcmp.lt.s32.totalorder %v805_v58, 0  ;;  %vm837_vm10 = vmand %vm833_vm5, %vm829_vm4 }
 0x171   : > { %v842_v61 = vadd.s32 8, %v826_v57  ;;  %vm828_vm11 = vcmp.ne.s32.totalorder %v812_v59, 0  ;;  %vm832_vm12 = vcmp.lt.s32.totalorder %v812_v59, 0  ;;  %vm838_vm13 = vmand %vm834_vm7, %vm830_vm6  ;;  %v839_v62 = vadd.s32 8, %v805_v58 }
 0x172   : > { %2916 = vmatpush3.bf16.msra.mxu0 %v3367_v6  ;;  %2998 = vmatpush3.bf16.msra.mxu1 %v3383_v21  ;;  %v840_v63 = vadd.s32 8, %v812_v59  ;;  %vm835_vm14 = vmand %vm831_vm9, %vm827_vm8  ;;  %v845_v0 = vsel %vm837_vm10, %v841_v60, %v819_v56  ;;  %v4421_v51 = vadd.s32 %v729_v15, %v728_v40  ;;  %s4702_s1 = scalar_lea.hbm %s4874_s24, %s2766_s27 }
 0x173   : > { %2917 = vmatprep.subr.bf16.mxu0 %v3368_v7  ;;  %2999 = vmatprep.subr.bf16.mxu1 %v3385_v23  ;;  %vm836_vm15 = vmand %vm832_vm12, %vm828_vm11  ;;  %v846_v1 = vsel %vm838_vm13, %v842_v61, %v826_v57  ;;  %v843_v2 = vsel %vm835_vm14, %v839_v62, %v805_v58  ;;  %vm849_vm0 = vcmp.ge.s32.totalorder %v845_v0, 1  ;;  %vm853_vm10 = vcmp.le.s32.totalorder %v845_v0, 6 }
 0x174   : > { %v844_v3 = vsel %vm836_vm15, %v840_v63, %v812_v59  ;;  %vm850_vm1 = vcmp.ge.s32.totalorder %v846_v1, 1  ;;  %vm847_vm2 = vcmp.ge.s32.totalorder %v843_v2, 1  ;;  %vm885_vm4 = vmpackc.low %vm849_vm0, %vm849_vm0  ;;  %vm851_vm6 = vcmp.le.s32.totalorder %v843_v2, 6 }
 0x175   : > { %vm848_vm3 = vcmp.ge.s32.totalorder %v844_v3, 1  ;;  %vm886_vm5 = vmpackc.low %vm850_vm1, %vm850_vm1  ;;  %vm852_vm8 = vcmp.le.s32.totalorder %v844_v3, 6  ;;  %vm854_vm11 = vcmp.le.s32.totalorder %v846_v1, 6  ;;  %v889_v5 = vsel %vm885_vm4, 65537, %v3892_v4 }
 0x176   : > { %2918 = vmatpush3.bf16.msra.mxu0 %v3368_v7  ;;  %3000 = vmatpush3.bf16.msra.mxu1 %v3385_v23  ;;  %vm883_vm7 = vmpackc.low %vm847_vm2, %vm847_vm2  ;;  %v890_v6 = vsel %vm886_vm5, 65537, %v3892_v4  ;;  %v730_v23 = vadd.s32 %v729_v15, %v4360_v31  ;;  %vm741_vm4 = vcmp.ge.s32.totalorder %v733_v39, 0  ;;  %vm4796_vm5 = vsmask.f32 3328 }
 0x177   : > { %2919 = vmatprep.subr.bf16.mxu0 %v3369_v8  ;;  %3001 = vmatprep.subr.bf16.mxu1 %v3387_v25  ;;  %vm884_vm9 = vmpackc.low %vm848_vm3, %vm848_vm3  ;;  %v887_v7 = vsel %vm883_vm7, 65537, %v3892_v4  ;;  %vm739_vm7 = vcmp.ge.s32.totalorder %v731_v41, 0  ;;  %v4435_v59 = vadd.s32 %v729_v15, %v726_v48 }
 0x178   : > { %vm1299_vm12 = vmpackc.low %vm851_vm6, %vm851_vm6  ;;  %vm738_vm2 = vcmp.ge.s32.totalorder %v730_v23, 0  ;;  %vm746_vm3 = vcmp.lt.s32.totalorder %v730_v23, 64  ;;  %vm749_vm6 = vcmp.lt.s32.totalorder %v733_v39, 64 }
 0x179   : > { %vm1300_vm13 = vmpackc.low %vm852_vm8, %vm852_vm8  ;;  %vm747_vm8 = vcmp.lt.s32.totalorder %v731_v41, 64 }
 0x17a   : > { %2920 = vmatpush3.bf16.msra.mxu0 %v3369_v8  ;;  %3002 = vmatpush3.bf16.msra.mxu1 %v3387_v25  ;;  %v888_v8 = vsel %vm884_vm9, 65537, %v3892_v4  ;;  %vm1301_vm14 = vmpackc.low %vm853_vm10, %vm853_vm10  ;;  %vm4797_vm9 = vsmask.f32 4352 }
 0x17b   : > { %2929 = vmatprep.subr.bf16.mxu0 %v3374_v12  ;;  %3003 = vmatprep.subr.bf16.mxu1 %v3389_v27  ;;  %vm1302_vm15 = vmpackc.low %vm854_vm11, %vm854_vm11  ;;  %v1305_v13 = vsel %vm1301_vm14, 65537, %v3892_v4 }
 0x17c   : > { %vm4458_vm14 = vmand %vm738_vm2, %vm746_vm3  ;;  %vm743_vm2 = vcmp.ge.s32.totalorder %v4435_v59, 0 }
 0x17d   : > { %2922 = vmatmul.mubr.bf16.vlgmr.msra.gmra.mrb[0].mxu0 %v3371_v9  ;;  %v4376_v9 = vcombine.low %v889_v5, %v890_v6 }
 0x17e   : > { %2925 = vmatprep.mubr.bf16.mxu0 %v3372_v10  ;;  %2930 = vmatpush3.bf16.msra.mxu0 %v3374_v12  ;;  %v4379_v10 = vcombine.low %v887_v7, %v888_v8  ;;  %v1304_v12 = vsel %vm1300_vm13, 65537, %v3892_v4  ;;  %vm750_vm13 = vcmp.lt.s32.totalorder %v4412_v34, 64 }
 0x17f   : > { %2931 = vmatprep.subr.bf16.mxu0 %v3376_v14  ;;  %3004 = vmatpush3.bf16.msra.mxu1 %v3389_v27  ;;  %v910_v21 = vshll.u32 %v4376_v9, 16 }
 0x180   : > { %3009 = vmatprep.subr.bf16.mxu1 %v4356_v29  ;;  %v899_v19 = vshrl.u32 %v4379_v10, 16 }
 0x181   : > { %v1487_v1 = vrot.slane %v910_v21, 1 }
 0x182   : > { %2932 = vmatpush3.bf16.msra.mxu0 %v3376_v14  ;;  %v1306_v14 = vsel %vm1302_vm15, 65537, %v3892_v4  ;;  %v901_v37 = vrot.slane %v899_v19, 4 }
 0x183   : > { %2933 = vmatprep.subr.bf16.mxu0 %v3378_v16 }
 0x185   : > { %2926 = vmatmul.mubr.bf16.gmra.mrb[4].mxu0 %v3373_v11  ;;  %v1303_v11 = vsel %vm1299_vm12, 65537, %v3892_v4  ;;  %vm742_vm12 = vcmp.ge.s32.totalorder %v4412_v34, 0 }
 0x186   : > { %2934 = vmatpush3.bf16.msra.mxu0 %v3378_v16  ;;  %v907_v16 = vshrl.u32 %v4376_v9, 16  ;;  %v4382_v17 = vcombine.low %v1303_v11, %v1304_v12 }
 0x187   : > { %2935 = vmatprep.subr.bf16.mxu0 %v3380_v18 }
 0x188   : > { %v909_v25 = vrot.slane %v907_v16, 4  ;;  %v1317_v27 = vshll.u32 %v4382_v17, 16 }
 0x18a   : > { %2936 = vmatpush3.bf16.msra.mxu0 %v3380_v18  ;;  %v4384_v18 = vcombine.low %v1305_v13, %v1306_v14  ;;  %v1319_v44 = vrot.slane %v1317_v27, 4 }
 0x18b   : > { %2937 = vmatprep.subr.bf16.mxu0 %v3382_v20 }
 0x18c   : > { %v1322_v30 = vshrl.u32 %v4384_v18, 16  ;;  %v1325_v33 = vshll.u32 %v4384_v18, 16 }
 0x18e   : > { %2938 = vmatpush3.bf16.msra.mxu0 %v3382_v20  ;;  %v902_v20 = vshll.u32 %v4379_v10, 16  ;;  %v1324_v45 = vrot.slane %v1322_v30, 3  ;;  %v1327_v46 = vrot.slane %v1325_v33, 4  ;;  %v4454_v5 = vrot.slane %v1322_v30, 7 }
 0x18f   : > { %2939 = vmatprep.subr.bf16.mxu0 %v3384_v22 }
 0x190   : > { %v904_v38 = vrot.slane %v902_v20, 5  ;;  %v4423_v52 = vrot.slane %v902_v20, 1  ;;  %v4430_v56 = vor.u32 %v1327_v46, %v1324_v45  ;;  %v1643_v23 = vor.u32 %v4454_v5, %v1325_v33 }
 0x192   : > { %2940 = vmatpush3.bf16.msra.mxu0 %v3384_v22  ;;  %v732_v22 = vadd.s32 %v729_v15, %v4363_v32  ;;  %v912_v32 = vrot.slane %v910_v21, 5  ;;  %v4415_v49 = vor.u32 %v904_v38, %v901_v37  ;;  %v1486_v0 = vor.u32 %v4423_v52, %v899_v19 }
 0x193   : > { %2941 = vmatprep.subr.bf16.mxu0 %v3386_v24 }
 0x194   : > { %vm740_vm0 = vcmp.ge.s32.totalorder %v732_v22, 0  ;;  %vm748_vm1 = vcmp.lt.s32.totalorder %v732_v22, 64  ;;  %v4417_v35 = vor.u32 %v912_v32, %v909_v25 }
 0x195   : > { %vm4448_vm15 = vmand %vm740_vm0, %vm748_vm1 }
 0x196   : > { %2942 = vmatpush3.bf16.msra.mxu0 %v3386_v24  ;;  %v727_v24 = vadd.s32 48, %v4360_v31  ;;  %v4440_v60 = vsel %vm4796_vm5, %v4415_v49, %v4417_v35  ;;  %vm1484_vm5 = vsmask.f32 7424  ;;  %vm4471_vm1 = vmand %vm741_vm4, %vm749_vm6  ;;  %vm1513_vm6 = vsmask.f32 256 }
 0x197   : > { %2943 = vmatprep.subr.bf16.mxu0 %v3388_v26  ;;  %vm4798_vm3 = vcmp.ne.s16.totalorder %v4440_v60, 0  ;;  %vm4480_vm0 = vmand %vm739_vm7, %vm747_vm8  ;;  %v1488_v19 = vsel %vm1484_vm5, %v1486_v0, %v1487_v1  ;;  %vm915_vm8 = vcmp.ne.s16.totalorder %v4415_v49, 0  ;;  %v3392_v49 = vld [vmem:[#allocation11 + $0x108] sm:$0xff]  }
 0x198   : > { %v4402_v42 = vadd.s32 %v729_v15, %v727_v24 }
 0x19a   : > { %2944 = vmatpush3.bf16.msra.mxu0 %v3388_v26  ;;  %v1314_v26 = vshrl.u32 %v4382_v17, 16  ;;  %vm744_vm10 = vcmp.ge.s32.totalorder %v4402_v42, 0  ;;  %vm752_vm11 = vcmp.lt.s32.totalorder %v4402_v42, 64  ;;  %v3410_v42 = vld [vmem:[#allocation11 + $0x50] sm:$0xff]  }
 0x19b   : > { %2949 = vmatprep.subr.bf16.mxu0 %v4354_v28  ;;  %vm4515_vm7 = vmand %vm744_vm10, %vm752_vm11  ;;  %vm4856_vm11 = vcmp.lt.s32.totalorder %v4421_v51, 64 }
 0x19c   : > { %v1316_v43 = vrot.slane %v1314_v26, 3  ;;  %v1640_v20 = vrot.slane %v1314_v26, 7  ;;  %vm4529_vm10 = vmand %vm742_vm12, %vm750_vm13  ;;  %vm1490_vm13 = vcmp.ne.s16.totalorder %v4423_v52, 0 }
 0x19e   : > { %v4428_v55 = vor.u32 %v1319_v44, %v1316_v43  ;;  %v1641_v44 = vor.u32 %v1640_v20, %v1317_v27 }
 0x1a0   : > { %v4467_v10 = vsel %vm4797_vm9, %v4428_v55, %v4430_v56  ;;  %vm751_vm9 = vcmp.lt.s32.totalorder %v4435_v59, 64  ;;  %vm1330_vm12 = vcmp.ne.s16.totalorder %v4428_v55, 0 }
 0x1a1   : > { %vm4799_vm4 = vcmp.ne.s16.totalorder %v4467_v10, 0 }
 0x250   : > { %v2923_v53 = vpop.f32.mrb[0].mxu0 }
 0x251   : > { %v690_v54 = vmul.f32 %v2923_v53, %v4410_v47  ;;  %v650_v31 = vpop.f32.mrb[1].mxu0 }
 0x252   : > { %v688_v57 = vmul.f32 %v4410_v47, %v650_v31  ;;  %v2924_v58 = vpop.f32.mrb[2].mxu0 }
 0x253   : > { %v705_v61 = vadd.f32 %v4419_v50, %v690_v54  ;;  %v691_v62 = vmul.f32 %v2924_v58, %v4410_v47  ;;  %v653_v63 = vpop.f32.mrb[3].mxu0  ;;  %v1644_v54 = vsel %vm1513_vm6, %v1640_v20, %v1643_v23 }
 0x254   : > { %v703_v3 = vadd.f32 %v4419_v50, %v688_v57  ;;  %v689_v4 = vmul.f32 %v4410_v47, %v653_v63 }
 0x255   : > { %v713_v6 = vmax.f32 %v705_v61, 0.0  ;;  %v706_v8 = vadd.f32 %v4419_v50, %v691_v62  ;;  %v1489_v62 = vor.u32 %v1487_v1, %v907_v16  ;;  %v3411_v61 = vld [vmem:[#allocation11 + $0x150] sm:$0xff]  }
 0x256   : > { %v711_v11 = vmax.f32 %v703_v3, 0.0  ;;  %v704_v13 = vadd.f32 %v4419_v50, %v689_v4 }
 0x257   : > { %v714_v14 = vmax.f32 %v706_v8, 0.0  ;;  %v780_v24 = vsel %vm4448_vm15, %v713_v6, 0.0 }
 0x258   : > { %v712_v21 = vmax.f32 %v704_v13, 0.0  ;;  %v2927_v22 = vpop.f32.mrb[4].mxu0  ;;  %v778_v37 = vsel %vm4458_vm14, %v711_v11, 0.0  ;;  %vm4857_vm14 = vcmp.ge.s32.totalorder %v4421_v51, 0 }
 0x259   : > { %v781_v25 = vsel %vm4471_vm1, %v714_v14, 0.0  ;;  %v4496_v30 = vpack.c.bf16 %v714_v14, %v713_v6  ;;  %v694_v36 = vmul.f32 %v2927_v22, %v4410_v47  ;;  %v666_v26 = vpop.f32.mrb[5].mxu0 }
 0x25a   : > { %v4501_v38 = vpack.c.bf16 %v781_v25, %v780_v24  ;;  %v779_v18 = vsel %vm4480_vm0, %v712_v21, 0.0  ;;  %v692_v33 = vmul.f32 %v4410_v47, %v666_v26  ;;  %v2928_v32 = vpop.f32.mrb[6].mxu0  ;;  %vm4542_vm0 = vmand %vm4857_vm14, %vm4856_vm11  ;;  %vm1645_vm11 = vcmp.ne.s16.totalorder %v1641_v44, 0 }
 0x25b   : > { %v786_v39 = vpack.c.bf16 %v779_v18, %v778_v37  ;;  %v709_v40 = vadd.f32 %v4419_v50, %v694_v36  ;;  %v695_v41 = vmul.f32 %v2928_v32, %v4410_v47  ;;  %v669_v43 = vpop.f32.mrb[7].mxu0  ;;  %vm1646_vm14 = vcmp.ne.s16.totalorder %v1644_v54, 0 }
 0x25c   : > { %791 = vst [vmem:[#allocation2 + $0x8] sm:$0xff] %v4501_v38  ;;  %v707_v46 = vadd.f32 %v4419_v50, %v692_v33  ;;  %v693_v48 = vmul.f32 %v4410_v47, %v669_v43  ;;  %v919_v17 = vsel %vm4798_vm3, %v4501_v38, 0  ;;  %v1334_v47 = vsel %vm4799_vm4, %v4501_v38, 0  ;;  %vm4553_vm4 = vmand %vm743_vm2, %vm751_vm9 }
 0x25d   : > { %790 = vst [vmem:[#allocation2] sm:$0xff] %v786_v39  ;;  %v717_v27 = vmax.f32 %v709_v40, 0.0  ;;  %v710_v53 = vadd.f32 %v4419_v50, %v695_v41  ;;  %vm1491_vm3 = vcmp.ne.s16.totalorder %v1488_v19, 0  ;;  %v947_v51 = vshrl.u32 %v919_v17, 16 }
 0x25e   : > { %v715_v31 = vmax.f32 %v707_v46, 0.0  ;;  %v708_v34 = vadd.f32 %v4419_v50, %v693_v48  ;;  %v950_v63 = vshll.u32 %v919_v17, 16  ;;  %v1362_v0 = vshrl.u32 %v1334_v47, 16 }
 0x25f   : > { %v718_v58 = vmax.f32 %v710_v53, 0.0  ;;  %v784_v3 = vsel %vm4515_vm7, %v717_v27, 0.0  ;;  %v1365_v6 = vshll.u32 %v1334_v47, 16  ;;  %v4571_v1 = vsel %vm1491_vm3, %v4501_v38, 0 }
 0x260   : > { %v716_v50 = vmax.f32 %v708_v34, 0.0  ;;  %v782_v4 = vsel %vm4529_vm10, %v715_v31, 0.0  ;;  %v949_v11 = vrot.slane %v947_v51, 3  ;;  %vm917_vm9 = vcmp.ne.s16.totalorder %v4417_v35, 0  ;;  %v3394_v35 = vld [vmem:[#allocation11 + $0x110] sm:$0xff]  }
 0x261   : > { %v785_v59 = vsel %vm4542_vm0, %v718_v58, 0.0  ;;  %vm1492_vm2 = vcmp.ne.s16.totalorder %v1489_v62, 0  ;;  %v952_v14 = vrot.slane %v950_v63, 4  ;;  %v1364_v20 = vrot.slane %v1362_v0, 4 }
 0x262   : > { %v789_v7 = vpack.c.bf16 %v785_v59, %v784_v3  ;;  %v783_v9 = vsel %vm4553_vm4, %v716_v50, 0.0  ;;  %v4567_v16 = vpack.c.bf16 %v716_v50, %v715_v31  ;;  %v1367_v22 = vrot.slane %v1365_v6, 5 }
 0x263   : > { %v4573_v8 = vpack.c.bf16 %v783_v9, %v782_v4  ;;  %v1519_v23 = vshrl.u32 %v4571_v1, 16  ;;  %vm1332_vm3 = vcmp.ne.s16.totalorder %v4430_v56, 0  ;;  %v1648_v32 = vsel %vm1645_vm11, %v4501_v38, 0 }
 0x264   : > { %793 = vst [vmem:[#allocation2 + $0x18] sm:$0xff] %v789_v7  ;;  %v872_v13 = vld [vmem:[#allocation2] sm:$0xf8]  ;;  %vm1181_vm7 = vcmask 1043456   ;;  %v953_v45 = vor.u32 %v952_v14, %v949_v11  ;;  %v1183_v17 = vrot.slane %v4501_v38, 4  ;;  %v1368_v47 = vor.u32 %v1367_v22, %v1364_v20 }
 0x265   : > { %v4576_v15 = vld [vmem:[#allocation2] sm:$0xf0]  ;;  %792 = vst [vmem:[#allocation2 + $0x10] sm:$0xff] %v4573_v8  ;;  %v918_v21 = vsel %vm915_vm8, %v872_v13, 0  ;;  %v4588_v18 = vsel %vm1646_vm14, %v4573_v8, 0  ;;  %v1495_v33 = vsel %vm1492_vm2, %v4573_v8, 0 }
 0x266   : > { %v1333_v19 = vsel %vm1330_vm12, %v4576_v15, 0  ;;  %v939_v24 = vshrl.u32 %v918_v21, 16  ;;  %v942_v25 = vshll.u32 %v918_v21, 16  ;;  %v1482_v37 = vld [vmem:[#allocation2] sm:$0x80]  ;;  %v1527_v48 = vshrl.u32 %v1495_v33, 16 }
 0x267   : > { %v1354_v36 = vshrl.u32 %v1333_v19, 16  ;;  %v1357_v26 = vshll.u32 %v1333_v19, 16  ;;  %v1493_v46 = vsel %vm1490_vm13, %v1482_v37, 0  ;;  %v1521_v54 = vrot.slane %v1519_v23, 7  ;;  %v1791_v19 = vld [vmem:[#allocation2 + $0x8] sm:$0xf8] }
 0x268   : > { %v941_v39 = vrot.slane %v939_v24, 3  ;;  %v944_v40 = vrot.slane %v942_v25, 4  ;;  %v1529_v31 = vrot.slane %v1527_v48, 7  ;;  %v1530_v57 = vshll.u32 %v1495_v33, 16  ;;  %v3414_v38 = vld [vmem:[#allocation11 + $0x60] sm:$0xff]  }
 0x269   : > { %v1356_v41 = vrot.slane %v1354_v36, 4  ;;  %v1359_v43 = vrot.slane %v1357_v26, 5  ;;  %v1671_v44 = vshll.u32 %v1648_v32, 16  ;;  %v1676_v34 = vshll.u32 %v4588_v18, 16 }
 0x26a   : > { %v945_v27 = vor.u32 %v944_v40, %v941_v39  ;;  %vm4862_vm0 = vsmask.f32 4352  ;;  %vm4863_vm11 = vsmask.f32 3328  ;;  %v1515_v52 = vshrl.u32 %v1493_v46, 16 }
 0x26b   : > { %v1360_v53 = vor.u32 %v1359_v43, %v1356_v41  ;;  %v1669_v63 = vshrl.u32 %v1648_v32, 16  ;;  %v1532_v4 = vor.u32 %v1530_v57, %v1529_v31  ;;  %v1673_v59 = vrot.slane %v1671_v44, 1  ;;  %v1792_v32 = vld [vmem:[#allocation2 + $0x18] sm:$0xf]  ;;  %vm4865_vm14 = vmmov %vm4862_vm0  ;;  %v3393_v44 = vld [vmem:[#allocation11 + $0xc8] sm:$0xff]  }
 0x26c   : > { %v954_v58 = vsel %vm4862_vm0, %v945_v27, %v953_v45  ;;  %v874_v62 = vld [vmem:[#allocation2 + $0x10] sm:$0xf]  ;;  %v4607_v20 = vrot.slane %v1676_v34, 1  ;;  %v1517_v36 = vrot.slane %v1515_v52, 7  ;;  %v1522_v26 = vshll.u32 %v4571_v1, 16  ;;  %vm4866_vm2 = vmmov %vm4863_vm11 }
 0x26d   : > { %v1369_v51 = vsel %vm4863_vm11, %v1360_v53, %v1368_v47  ;;  %v1290_v50 = vld [vmem:[#allocation2 + $0x10] sm:$0x1f]  ;;  %2945 = vmatprep.mubr.bf16.mxu0 %v954_v58  ;;  %v920_v0 = vsel %vm917_vm9, %v874_v62, 0  ;;  %v4605_v13 = vsel %vm1513_vm6, %v1521_v54, %v1532_v4  ;;  %v1674_v14 = vor.u32 %v1673_v59, %v1669_v63  ;;  %v1942_v53 = vld [vmem:[#allocation2 + $0x8] sm:$0xf0]  ;;  %vm2682_vm0 = vmpackc.low %vm4471_vm1, %vm4448_vm15 }
 0x26e   : > { %3005 = vmatprep.mubr.bf16.mxu1 %v1369_v51  ;;  %v1335_v3 = vsel %vm1332_vm3, %v1290_v50, 0  ;;  %v956_v6 = vshrl.u32 %v920_v0, 16  ;;  %v959_v7 = vshll.u32 %v920_v0, 16  ;;  %v1185_v21 = vrot.slane %v874_v62, 4  ;;  %v3395_v63 = vld [vmem:[#allocation11 + $0xd0] sm:$0xff]   ;;  %vm4868_vm15 = vmmov %vm4865_vm14 }
 0x26f   : > { %v1371_v9 = vshrl.u32 %v1335_v3, 16  ;;  %v1374_v11 = vshll.u32 %v1335_v3, 16  ;;  %v4612_v37 = vsel %vm1484_vm5, %v1674_v14, %v4607_v20  ;;  %v1793_v41 = vsel %vm915_vm8, %v1791_v19, 0  ;;  %v2071_v12 = vld [vmem:[#allocation2 + $0x18] sm:$0x1f]  ;;  %vm4869_vm1 = vmmov %vm4865_vm14 }
 0x270   : > { %v958_v22 = vrot.slane %v956_v6, 3  ;;  %v961_v23 = vrot.slane %v959_v7, 4  ;;  %v4617_v33 = vsel %vm1181_vm7, %v1183_v17, %v1185_v21  ;;  %vm4864_vm13 = vcmp.ne.s16.totalorder %v4440_v60, 0  ;;  %vm4870_vm8 = vmmov %vm4866_vm2 }
 0x271   : > { %v1373_v24 = vrot.slane %v1371_v9, 4  ;;  %v1376_v25 = vrot.slane %v1374_v11, 5  ;;  %v1794_v43 = vsel %vm4864_vm13, %v4573_v8, 0  ;;  %v1524_v1 = vor.u32 %v1522_v26, %v1521_v54 }
 0x272   : > { %v962_v39 = vor.u32 %v961_v23, %v958_v22  ;;  %v1814_v46 = vshrl.u32 %v1793_v41, 16  ;;  %v1817_v48 = vshll.u32 %v1793_v41, 16  ;;  %v1822_v27 = vshrl.u32 %v1794_v43, 16 }
 0x273   : > { %v1377_v40 = vor.u32 %v1376_v25, %v1373_v24  ;;  %v1825_v34 = vshll.u32 %v1794_v43, 16  ;;  %v1795_v60 = vsel %vm917_vm9, %v1792_v32, 0  ;;  %v1525_v54 = vsel %vm1513_vm6, %v1517_v36, %v1524_v1  ;;  %v3398_v1 = vld [vmem:[#allocation11 + $0x120] sm:$0xff]   ;;  %vm2685_vm9 = vmpackc.low %vm4553_vm4, %vm4529_vm10 }
 0x274   : > { %v963_v31 = vsel %vm4865_vm14, %v953_v45, %v962_v39  ;;  %v1816_v58 = vrot.slane %v1814_v46, 3  ;;  %v1819_v51 = vrot.slane %v1817_v48, 4  ;;  %v1824_v45 = vrot.slane %v1822_v27, 3  ;;  %v3399_v46 = vld [vmem:[#allocation11 + $0xe0] sm:$0xff]  }
 0x275   : > { %v1378_v57 = vsel %vm4866_vm2, %v1368_v47, %v1377_v40  ;;  %2946 = vmatmul.mubr.bf16.vlgmr.msra.gmra.mrb[8].mxu0 %v963_v31  ;;  %v1827_v47 = vrot.slane %v1825_v34, 4  ;;  %v1831_v62 = vshrl.u32 %v1795_v60, 16  ;;  %v1834_v50 = vshll.u32 %v1795_v60, 16  ;;  %v3401_v31 = vld [vmem:[#allocation11 + $0xe8] sm:$0xff]   ;;  %v3404_v34 = vld [vmem:[#allocation11 + $0x138] sm:$0xff]  }
 0x276   : > { %3006 = vmatmul.mubr.bf16.vlgmr.msra.gmra.mrb[0].mxu1 %v1378_v57  ;;  %2950 = vmatpush3.bf16.msra.mxu0 %v4354_v28  ;;  %v1963_v52 = vrot.slane %v1942_v53, 4  ;;  %v1820_v0 = vor.u32 %v1819_v51, %v1816_v58  ;;  %v1964_v3 = vrot.slane %v4573_v8, 4  ;;  %v2072_v28 = vsel %vm1330_vm12, %v1942_v53, 0  ;;  %v3400_v53 = vld [vmem:[#allocation11 + $0x128] sm:$0xff]   ;;  %vm4871_vm12 = vmmov %vm4866_vm2  ;;  %v3405_v60 = vld [vmem:[#allocation11 + $0xf8] sm:$0xff]  }
 0x277   : > { %3010 = vmatpush3.bf16.msra.mxu1 %v4356_v29  ;;  %2965 = vmatprep.mubr.msk.bf16.mxu0 %vm2682_vm0, %v4496_v30  ;;  %v1966_v29 = vrot.slane %v1792_v32, 4  ;;  %v1828_v4 = vor.u32 %v1827_v47, %v1824_v45  ;;  %v1833_v59 = vrot.slane %v1831_v62, 3  ;;  %v1836_v6 = vrot.slane %v1834_v50, 4  ;;  %v3407_v58 = vld [vmem:[#allocation11 + $0x140] sm:$0xff]   ;;  %v3408_v45 = vld [vmem:[#allocation11 + $0x48] sm:$0xff]   ;;  %v3418_v50 = vld [vmem:[#allocation11 + $0x70] sm:$0xff]  }
 0x278   : > { %3025 = vmatprep.mubr.bf16.mxu1 %v1525_v54  ;;  %2951 = vmatprep.subr.bf16.mxu0 %v3392_v49  ;;  %vm4867_vm6 = vcmp.ne.s16.totalorder %v4467_v10, 0  ;;  %v4648_v30 = vsel %vm1181_vm7, %v1963_v52, %v1964_v3  ;;  %v2093_v9 = vshrl.u32 %v2072_v28, 16  ;;  %v2096_v55 = vshll.u32 %v2072_v28, 16  ;;  %v3396_v10 = vld [vmem:[#allocation11 + $0x118] sm:$0xff]   ;;  %v3406_v54 = vld [vmem:[#allocation11 + $0x40] sm:$0xff]   ;;  %v3409_v47 = vld [vmem:[#allocation11 + $0x148] sm:$0xff]  }
 0x279   : > { %3011 = vmatprep.subr.bf16.mxu1 %v3393_v44  ;;  %v2073_v2 = vsel %vm4867_vm6, %v4573_v8, 0  ;;  %v4651_v7 = vsel %vm1181_vm7, %v1964_v3, %v1966_v29  ;;  %v4654_v11 = vsel %vm4868_vm15, %v1820_v0, %v1828_v4  ;;  %v1837_v14 = vor.u32 %v1836_v6, %v1833_v59  ;;  %v3397_v8 = vld [vmem:[#allocation11 + $0xd8] sm:$0xff]   ;;  %v1639_v52 = vld [vmem:[#allocation2 + $0x18] sm:$0x1]  ;;  %v3422_v29 = vld [vmem:[#allocation11 + $0x180] sm:$0xff]  }
 0x27a   : > { %2952 = vmatpush3.bf16.msra.mxu0 %v3392_v49  ;;  %v2101_v21 = vshrl.u32 %v2073_v2, 16  ;;  %v2104_v19 = vshll.u32 %v2073_v2, 16  ;;  %v2095_v22 = vrot.slane %v2093_v9, 4  ;;  %v2098_v23 = vrot.slane %v2096_v55, 5  ;;  %v3402_v49 = vld [vmem:[#allocation11 + $0x130] sm:$0xff]   ;;  %v3420_v0 = vld [vmem:[#allocation11 + $0x78] sm:$0xff]  }
 0x27b   : > { %3012 = vmatpush3.bf16.msra.mxu1 %v3393_v44  ;;  %2953 = vmatprep.subr.bf16.mxu0 %v3394_v35  ;;  %v2074_v24 = vsel %vm1332_vm3, %v2071_v12, 0  ;;  %v4659_v25 = vsel %vm4869_vm1, %v1828_v4, %v1837_v14  ;;  %v3403_v44 = vld [vmem:[#allocation11 + $0xf0] sm:$0xff]   ;;  %v1182_v51 = vrot.slane %v4576_v15, 4  ;;  %v3412_v15 = vld [vmem:[#allocation11 + $0x58] sm:$0xff]   ;;  %vm1647_vm4 = vcmp.ne.s16.totalorder %v4454_v5, 0  ;;  %v3423_v6 = vld [vmem:[#allocation11 + $0x188] sm:$0xff]  }
 0x27c   : > { %3013 = vmatprep.subr.bf16.mxu1 %v3395_v63  ;;  %v2103_v36 = vrot.slane %v2101_v21, 4  ;;  %v2106_v26 = vrot.slane %v2104_v19, 5  ;;  %v2110_v32 = vshrl.u32 %v2074_v24, 16  ;;  %v2099_v39 = vor.u32 %v2098_v23, %v2095_v22  ;;  %v3421_v3 = vld [vmem:[#allocation11 + $0x178] sm:$0xff]   ;;  %v3424_v12 = vld [vmem:[#allocation11 + $0x190] sm:$0xff]   ;;  %v3426_v9 = vld [vmem:[#allocation11 + $0x1a0] sm:$0xff]  }
 0x27d   : > { %v2113_v40 = vshll.u32 %v2074_v24, 16  ;;  %v1184_v62 = vsel %vm1181_vm7, %v1182_v51, %v1183_v17  ;;  %v3415_v17 = vld [vmem:[#allocation11 + $0x160] sm:$0xff]   ;;  %v1680_v4 = vshrl.u32 %v4588_v18, 16  ;;  %v3425_v18 = vld [vmem:[#allocation11 + $0x198] sm:$0xff]   ;;  %v3431_v14 = vld [vmem:[#allocation11 + $0x1c8] sm:$0xff]  }
 0x27e   : > { %2954 = vmatpush3.bf16.msra.mxu0 %v3394_v35  ;;  %v2107_v41 = vor.u32 %v2106_v26, %v2103_v36  ;;  %v2112_v43 = vrot.slane %v2110_v32, 4  ;;  %v3419_v35 = vld [vmem:[#allocation11 + $0x170] sm:$0xff]   ;;  %v3429_v55 = vld [vmem:[#allocation11 + $0x1b8] sm:$0xff]   ;;  %v3439_v24 = vld [vmem:[#allocation11 + $0x208] sm:$0xff]  }
 0x27f   : > { %3014 = vmatpush3.bf16.msra.mxu1 %v3395_v63  ;;  %2955 = vmatprep.subr.bf16.mxu0 %v3396_v10  ;;  %v2115_v48 = vrot.slane %v2113_v40, 5  ;;  %v1650_v63 = vsel %vm1647_vm4, %v1639_v52, 0  ;;  %v1682_v5 = vor.u32 %v1680_v4, %v4607_v20  ;;  %v3427_v20 = vld [vmem:[#allocation11 + $0x1a8] sm:$0xff]   ;;  %v3432_v21 = vld [vmem:[#allocation11 + $0x1d0] sm:$0xff]   ;;  %v3433_v19 = vld [vmem:[#allocation11 + $0x1d8] sm:$0xff]  }
 0x280   : > { %3015 = vmatprep.subr.bf16.mxu1 %v3397_v8  ;;  %v4662_v56 = vsel %vm4870_vm8, %v2099_v39, %v2107_v41  ;;  %v1684_v28 = vshll.u32 %v1650_v63, 16  ;;  %v3436_v22 = vld [vmem:[#allocation11 + $0x1f0] sm:$0xff]   ;;  %v3437_v23 = vld [vmem:[#allocation11 + $0x1f8] sm:$0xff]   ;;  %v3442_v26 = vld [vmem:[#allocation11 + $0x220] sm:$0xff]  }
 0x281   : > { %v2116_v27 = vor.u32 %v2115_v48, %v2112_v43  ;;  %v3441_v36 = vld [vmem:[#allocation11 + $0x218] sm:$0xff]   ;;  %v3443_v32 = vld [vmem:[#allocation11 + $0x228] sm:$0xff]   ;;  %v3444_v39 = vld [vmem:[#allocation11 + $0x230] sm:$0xff]  }
 0x282   : > { %2956 = vmatpush3.bf16.msra.mxu0 %v3396_v10  ;;  %v1686_v59 = vrot.slane %v1684_v28, 1  ;;  %v3434_v10 = vld [vmem:[#allocation11 + $0x1e0] sm:$0xff]   ;;  %v3448_v43 = vld [vmem:[#allocation15 + $0x10] sm:$0xff]   ;;  %v3451_v48 = vld [vmem:[#allocation15 + $0x28] sm:$0xff]  }
 0x283   : > { %3016 = vmatpush3.bf16.msra.mxu1 %v3397_v8  ;;  %2957 = vmatprep.subr.bf16.mxu0 %v3398_v1  ;;  %v4665_v57 = vsel %vm4871_vm12, %v2107_v41, %v2116_v27  ;;  %v3435_v8 = vld [vmem:[#allocation11 + $0x1e8] sm:$0xff]   ;;  %v3445_v41 = vld [vmem:[#allocation11 + $0x238] sm:$0xff]  }
 0x284   : > { %3017 = vmatprep.subr.bf16.mxu1 %v3399_v46  ;;  %v1687_v2 = vsel %vm1484_vm5, %v1682_v5, %v1686_v59  ;;  %v3446_v40 = vld [vmem:[#allocation15] sm:$0xff]   ;;  %v3453_v27 = vld [vmem:[#allocation15 + $0x38] sm:$0xff]  }
 0x285   : > { %v2791_v4 = vld [vmem:[%s2388_s6 + $0x8] sm:$0xff]   ;;  %v2774_v59 = vld [vmem:[%s2388_s6] sm:$0xff]   ;;  %s3736_s6 = scalar_lea.vmem %s4697_s28, 256 }
 0x286   : > { %2958 = vmatpush3.bf16.msra.mxu0 %v3398_v1  ;;  %v3449_v1 = vld [vmem:[#allocation15 + $0x18] sm:$0xff]   ;;  %p3737_p0 = scmp.ne.s32.totalorder %s4697_s28, %s3736_s6  ;;  %p3744_p7 = scmp.lt.s32.totalorder %s3742_s3, %s3736_s6 }
 0x287   : > { %3018 = vmatpush3.bf16.msra.mxu1 %v3399_v46  ;;  %2959 = vmatprep.subr.bf16.mxu0 %v3400_v53  ;;  %v3450_v46 = vld [vmem:[#allocation15 + $0x20] sm:$0xff]  }
 0x288   : > { %3019 = vmatprep.subr.bf16.mxu1 %v3401_v31  ;;  %p3738_p5 = pnand %p3737_p0, %p4875_p3  ;;  %p3745_p1 = por %p3744_p7, %p3743_p9 }
 0x28a   : > { %2960 = vmatpush3.bf16.msra.mxu0 %v3400_v53  ;;  %p3739_p2 = pneg %p3738_p5 }
 0x28b   : > { %3020 = vmatpush3.bf16.msra.mxu1 %v3401_v31  ;;  %2961 = vmatprep.subr.bf16.mxu0 %v3402_v49 }
 0x28c   : > { %3021 = vmatprep.subr.bf16.mxu1 %v3403_v44  ;;  %p3746_p11 = pnand %p3745_p1, %p3739_p2 }
 0x28e   : > { %2962 = vmatpush3.bf16.msra.mxu0 %v3402_v49 }
 0x28f   : > { %3022 = vmatpush3.bf16.msra.mxu1 %v3403_v44  ;;  %2963 = vmatprep.subr.bf16.mxu0 %v3404_v34 }
 0x290   : > { %3023 = vmatprep.subr.bf16.mxu1 %v3405_v60 }
 0x292   : > { %2964 = vmatpush3.bf16.msra.mxu0 %v3404_v34  ;;  %v2746_v34 = vld [vmem:[#allocation12] ss:$0 sm:$0xff] }
 0x293   : > { %3024 = vmatpush3.bf16.msra.mxu1 %v3405_v60  ;;  %2969 = vmatprep.subr.bf16.mxu0 %v3406_v54 }
 0x294   : > { %3029 = vmatprep.subr.bf16.mxu1 %v3407_v58 }
 0x295   : > { %2966 = vmatmul.mubr.msk.bf16.vlgmr.msra.gmra.mrb[8].mxu0 %vm2685_vm9, %v4567_v16  ;;  %v3413_v16 = vld [vmem:[#allocation11 + $0x158] sm:$0xff]  }
 0x296   : > { %3026 = vmatmul.mubr.bf16.vlgmr.msra.gmra.mrb[0].mxu1 %v4605_v13  ;;  %2970 = vmatpush3.bf16.msra.mxu0 %v3406_v54  ;;  %v3416_v13 = vld [vmem:[#allocation11 + $0x68] sm:$0xff]  }
 0x297   : > { %2985 = vmatprep.mubr.bf16.mxu0 %v1184_v62  ;;  %3030 = vmatpush3.bf16.msra.mxu1 %v3407_v58  ;;  %v2747_v58 = vld [vmem:[#allocation14] ss:$0 sm:$0xff] }
 0x298   : > { %3045 = vmatprep.mubr.bf16.mxu1 %v4612_v37  ;;  %2971 = vmatprep.subr.bf16.mxu0 %v3408_v45  ;;  %v3417_v37 = vld [vmem:[#allocation11 + $0x168] sm:$0xff]  }
 0x299   : > { %3031 = vmatprep.subr.bf16.mxu1 %v3409_v47 }
 0x29a   : > { %2972 = vmatpush3.bf16.msra.mxu0 %v3408_v45 }
 0x29b   : > { %3032 = vmatpush3.bf16.msra.mxu1 %v3409_v47  ;;  %2973 = vmatprep.subr.bf16.mxu0 %v3410_v42 }
 0x29c   : > { %3033 = vmatprep.subr.bf16.mxu1 %v3411_v61 }
 0x29e   : > { %2974 = vmatpush3.bf16.msra.mxu0 %v3410_v42 }
 0x29f   : > { %3034 = vmatpush3.bf16.msra.mxu1 %v3411_v61  ;;  %2975 = vmatprep.subr.bf16.mxu0 %v3412_v15 }
 0x2a0   : > { %3035 = vmatprep.subr.bf16.mxu1 %v3413_v16 }
 0x2a2   : > { %2976 = vmatpush3.bf16.msra.mxu0 %v3412_v15 }
 0x2a3   : > { %3036 = vmatpush3.bf16.msra.mxu1 %v3413_v16  ;;  %2977 = vmatprep.subr.bf16.mxu0 %v3414_v38 }
 0x2a4   : > { %3037 = vmatprep.subr.bf16.mxu1 %v3415_v17 }
 0x2a6   : > { %2978 = vmatpush3.bf16.msra.mxu0 %v3414_v38 }
 0x2a7   : > { %3038 = vmatpush3.bf16.msra.mxu1 %v3415_v17  ;;  %2979 = vmatprep.subr.bf16.mxu0 %v3416_v13 }
 0x2a8   : > { %3039 = vmatprep.subr.bf16.mxu1 %v3417_v37 }
 0x2aa   : > { %2980 = vmatpush3.bf16.msra.mxu0 %v3416_v13 }
 0x2ab   : > { %3040 = vmatpush3.bf16.msra.mxu1 %v3417_v37  ;;  %2981 = vmatprep.subr.bf16.mxu0 %v3418_v50 }
 0x2ac   : > { %3041 = vmatprep.subr.bf16.mxu1 %v3419_v35 }
 0x2ae   : > { %2982 = vmatpush3.bf16.msra.mxu0 %v3418_v50 }
 0x2af   : > { %3042 = vmatpush3.bf16.msra.mxu1 %v3419_v35  ;;  %2983 = vmatprep.subr.bf16.mxu0 %v3420_v0 }
 0x2b0   : > { %3043 = vmatprep.subr.bf16.mxu1 %v3421_v3 }
 0x2b2   : > { %2984 = vmatpush3.bf16.msra.mxu0 %v3420_v0 }
 0x2b3   : > { %3044 = vmatpush3.bf16.msra.mxu1 %v3421_v3  ;;  %3109 = vmatprep.subr.bf16.mxu0 %v3446_v40 }
 0x2b4   : > { %3049 = vmatprep.subr.bf16.mxu1 %v3422_v29 }
 0x2b5   : > { %2986 = vmatmul.mubr.bf16.vlgmr.msra.gmra.mrb[8].mxu0 %v4617_v33  ;;  %v3428_v33 = vld [vmem:[#allocation11 + $0x1b0] sm:$0xff]  }
 0x2b6   : > { %3046 = vmatmul.mubr.bf16.vlgmr.msra.gmra.mrb[0].mxu1 %v1687_v2  ;;  %3110 = vmatpush3.bf16.msra.mxu0 %v3446_v40 }
 0x2b7   : > { %3050 = vmatpush3.bf16.msra.mxu1 %v3422_v29  ;;  %3065 = vmatprep.mubr.bf16.mxu1 %v4654_v11  ;;  %v3430_v11 = vld [vmem:[#allocation11 + $0x1c0] sm:$0xff]  }
 0x2b8   : > { %3051 = vmatprep.subr.bf16.mxu1 %v3423_v6  ;;  %v2756_v29 = vld [vmem:[#allocation17] ss:$0 sm:$0xff] }
 0x2bb   : > { %3052 = vmatpush3.bf16.msra.mxu1 %v3423_v6  ;;  %v2757_v6 = vld [vmem:[#allocation18] ss:$0 sm:$0xff] }
 0x2bc   : > { %3053 = vmatprep.subr.bf16.mxu1 %v3424_v12 }
 0x2bf   : > { %3054 = vmatpush3.bf16.msra.mxu1 %v3424_v12  ;;  %v2779_v12 = vunpack.c.l.bf16 %v2791_v4 }
 0x2c0   : > { %3055 = vmatprep.subr.bf16.mxu1 %v3425_v18 }
 0x2c3   : > { %3056 = vmatpush3.bf16.msra.mxu1 %v3425_v18 }
 0x2c4   : > { %3057 = vmatprep.subr.bf16.mxu1 %v3426_v9 }
 0x2c7   : > { %3058 = vmatpush3.bf16.msra.mxu1 %v3426_v9 }
 0x2c8   : > { %3059 = vmatprep.subr.bf16.mxu1 %v3427_v20 }
 0x2cb   : > { %3060 = vmatpush3.bf16.msra.mxu1 %v3427_v20  ;;  %v2775_v20 = vunpack.c.l.bf16 %v2774_v59 }
 0x2cc   : > { %3061 = vmatprep.subr.bf16.mxu1 %v3428_v33 }
 0x2cf   : > { %3062 = vmatpush3.bf16.msra.mxu1 %v3428_v33 }
 0x2d0   : > { %3063 = vmatprep.subr.bf16.mxu1 %v3429_v55 }
 0x2d3   : > { %3064 = vmatpush3.bf16.msra.mxu1 %v3429_v55 }
 0x2d4   : > { %3069 = vmatprep.subr.bf16.mxu1 %v3430_v11 }
 0x2d6   : > { %3066 = vmatmul.mubr.bf16.vlgmr.msra.gmra.mrb[0].mxu1 %v4659_v25  ;;  %v3440_v25 = vld [vmem:[#allocation11 + $0x210] sm:$0xff]  }
 0x2d7   : > { %3070 = vmatpush3.bf16.msra.mxu1 %v3430_v11  ;;  %3085 = vmatprep.mubr.bf16.mxu1 %v4648_v30  ;;  %v3438_v30 = vld [vmem:[#allocation11 + $0x200] sm:$0xff]  }
 0x2d8   : > { %3071 = vmatprep.subr.bf16.mxu1 %v3431_v14 }
 0x2db   : > { %3072 = vmatpush3.bf16.msra.mxu1 %v3431_v14  ;;  %v2780_v14 = vunpack.c.h.bf16 %v2791_v4 }
 0x2dc   : > { %3073 = vmatprep.subr.bf16.mxu1 %v3432_v21 }
 0x2df   : > { %3074 = vmatpush3.bf16.msra.mxu1 %v3432_v21 }
 0x2e0   : > { %3075 = vmatprep.subr.bf16.mxu1 %v3433_v19 }
 0x2e3   : > { %3076 = vmatpush3.bf16.msra.mxu1 %v3433_v19 }
 0x2e4   : > { %3077 = vmatprep.subr.bf16.mxu1 %v3434_v10 }
 0x2e7   : > { %3078 = vmatpush3.bf16.msra.mxu1 %v3434_v10 }
 0x2e8   : > { %3079 = vmatprep.subr.bf16.mxu1 %v3435_v8 }
 0x2eb   : > { %3080 = vmatpush3.bf16.msra.mxu1 %v3435_v8  ;;  %v2776_v8 = vunpack.c.h.bf16 %v2774_v59 }
 0x2ec   : > { %3081 = vmatprep.subr.bf16.mxu1 %v3436_v22 }
 0x2ef   : > { %3082 = vmatpush3.bf16.msra.mxu1 %v3436_v22 }
 0x2f0   : > { %3083 = vmatprep.subr.bf16.mxu1 %v3437_v23 }
 0x2f3   : > { %3084 = vmatpush3.bf16.msra.mxu1 %v3437_v23 }
 0x2f4   : > { %3089 = vmatprep.subr.bf16.mxu1 %v3438_v30 }
 0x2f6   : > { %3086 = vmatmul.mubr.bf16.vlgmr.msra.gmra.mrb[0].mxu1 %v4651_v7  ;;  %v3447_v7 = vld [vmem:[#allocation15 + $0x8] sm:$0xff]  }
 0x2f7   : > { %3090 = vmatpush3.bf16.msra.mxu1 %v3438_v30  ;;  %3105 = vmatprep.mubr.bf16.mxu1 %v4662_v56  ;;  %v3452_v56 = vld [vmem:[#allocation15 + $0x30] sm:$0xff]  }
 0x2f8   : > { %3091 = vmatprep.subr.bf16.mxu1 %v3439_v24  ;;  %3111 = vmatprep.subr.bf16.mxu0 %v3447_v7 }
 0x2f9   : > { %3112 = vmatpush3.bf16.msra.mxu0 %v3447_v7 }
 0x2fa   : > { %3113 = vmatprep.subr.bf16.mxu0 %v3448_v43 }
 0x2fb   : > { %3092 = vmatpush3.bf16.msra.mxu1 %v3439_v24 }
 0x2fc   : > { %3093 = vmatprep.subr.bf16.mxu1 %v3440_v25 }
 0x2fd   : > { %3114 = vmatpush3.bf16.msra.mxu0 %v3448_v43 }
 0x2fe   : > { %3115 = vmatprep.subr.bf16.mxu0 %v3449_v1 }
 0x2ff   : > { %3094 = vmatpush3.bf16.msra.mxu1 %v3440_v25 }
 0x300   : > { %3095 = vmatprep.subr.bf16.mxu1 %v3441_v36 }
 0x301   : > { %3116 = vmatpush3.bf16.msra.mxu0 %v3449_v1 }
 0x302   : > { %3117 = vmatprep.subr.bf16.mxu0 %v3450_v46 }
 0x303   : > { %3096 = vmatpush3.bf16.msra.mxu1 %v3441_v36 }
 0x304   : > { %3097 = vmatprep.subr.bf16.mxu1 %v3442_v26 }
 0x305   : > { %3118 = vmatpush3.bf16.msra.mxu0 %v3450_v46 }
 0x306   : > { %3119 = vmatprep.subr.bf16.mxu0 %v3451_v48 }
 0x307   : > { %3098 = vmatpush3.bf16.msra.mxu1 %v3442_v26 }
 0x308   : > { %3099 = vmatprep.subr.bf16.mxu1 %v3443_v32 }
 0x309   : > { %3120 = vmatpush3.bf16.msra.mxu0 %v3451_v48 }
 0x30a   : > { %3121 = vmatprep.subr.bf16.mxu0 %v3452_v56 }
 0x30b   : > { %3100 = vmatpush3.bf16.msra.mxu1 %v3443_v32 }
 0x30c   : > { %3101 = vmatprep.subr.bf16.mxu1 %v3444_v39 }
 0x30d   : > { %3122 = vmatpush3.bf16.msra.mxu0 %v3452_v56 }
 0x30e   : > { %3123 = vmatprep.subr.bf16.mxu0 %v3453_v27 }
 0x30f   : > { %3102 = vmatpush3.bf16.msra.mxu1 %v3444_v39 }
 0x310   : > { %3103 = vmatprep.subr.bf16.mxu1 %v3445_v41 }
 0x311   : > { %3124 = vmatpush3.bf16.msra.mxu0 %v3453_v27 }
 0x313   : > { %3104 = vmatpush3.bf16.msra.mxu1 %v3445_v41 }
 0x316   : > { %3106 = vmatmul.mubr.bf16.vlgmr.msra.gmra.mrb[0].mxu1 %v4665_v57 }
 0x388   : > { %v2987_v53 = vpop.f32.mrb[8].mxu0 }
 0x389   : > { %v1271_v31 = vpop.f32.mrb[9].mxu0 }
 0x38a   : > { %v2988_v49 = vpop.f32.mrb[10].mxu0 }
 0x38b   : > { %v1274_v44 = vpop.f32.mrb[11].mxu0 }
 0x3e9   : > { %v3107_v57 = vpop.f32.mrb[0].mxu1 }
 0x3ea   : > { %v3129_v60 = vadd.f32 %v3107_v57, %v2987_v53  ;;  %v2202_v54 = vpop.f32.mrb[1].mxu1 }
 0x3eb   : > { %v3130_v51 = vadd.f32 %v2202_v54, %v1271_v31  ;;  %v3108_v45 = vpop.f32.mrb[2].mxu1 }
 0x3ec   : > { %v2230_v47 = vmul.f32 %v3129_v60, %v2746_v34  ;;  %v3131_v62 = vadd.f32 %v3108_v45, %v2988_v49  ;;  %v2205_v42 = vpop.f32.mrb[3].mxu1 }
 0x3ed   : > { %v2228_v61 = vmul.f32 %v3130_v51, %v2746_v34  ;;  %v3132_v15 = vadd.f32 %v2205_v42, %v1274_v44 }
 0x3ee   : > { %v2241_v16 = vadd.f32 %v2747_v58, %v2230_v47  ;;  %v2231_v38 = vmul.f32 %v3131_v62, %v2746_v34 }
 0x3ef   : > { %v2239_v17 = vadd.f32 %v2747_v58, %v2228_v61  ;;  %v2229_v13 = vmul.f32 %v3132_v15, %v2746_v34 }
 0x3f0   : > { %v2242_v37 = vadd.f32 %v2747_v58, %v2231_v38  ;;  %v2245_v52 = vmax.f32 %v2241_v16, 0.0 }
 0x3f1   : > { %v2240_v50 = vadd.f32 %v2747_v58, %v2229_v13  ;;  %v2243_v63 = vmax.f32 %v2239_v17, 0.0 }
 0x3f2   : > { %v2246_v35 = vmax.f32 %v2242_v37, 0.0 }
 0x3f3   : > { %v2244_v0 = vmax.f32 %v2240_v50, 0.0 }
 0x3f4   : > { %v2248_v3 = vpack.c.bf16 %v2246_v35, %v2245_v52 }
 0x3f5   : > { %v2247_v28 = vpack.c.bf16 %v2244_v0, %v2243_v63 }
 0x3f7   : > { %3125 = vmatprep.mubr.bf16.mxu0 %v2247_v28 }
 0x3f8   : > { %3126 = vmatmul.mubr.bf16.vlgmr.msra.gmra.mrb[12].mxu0 %v2248_v3 }
 0x4cb   : > { %v3127_v5 = vpop.f32.mrb[12].mxu0 }
 0x4cc   : > { %v2371_v2 = vmul.f32 %v3127_v5, %v2756_v29  ;;  %v2347_v18 = vpop.f32.mrb[13].mxu0 }
 0x4cd   : > { %v2369_v9 = vmul.f32 %v2756_v29, %v2347_v18  ;;  %v3128_v33 = vpop.f32.mrb[14].mxu0 }
 0x4ce   : > { %v2382_v55 = vadd.f32 %v2757_v6, %v2371_v2  ;;  %v2372_v11 = vmul.f32 %v3128_v33, %v2756_v29  ;;  %v2350_v21 = vpop.f32.mrb[15].mxu0 }
 0x4cf   : > { %v2380_v19 = vadd.f32 %v2757_v6, %v2369_v9  ;;  %v2370_v10 = vmul.f32 %v2756_v29, %v2350_v21 }
 0x4d0   : > { %v2399_v22 = vadd.f32 %v2779_v12, %v2382_v55  ;;  %v2383_v23 = vadd.f32 %v2757_v6, %v2372_v11 }
 0x4d1   : > { %v2397_v30 = vadd.f32 %v2775_v20, %v2380_v19  ;;  %v2381_v24 = vadd.f32 %v2757_v6, %v2370_v10 }
 0x4d2   : > { %v2400_v25 = vadd.f32 %v2780_v14, %v2383_v23  ;;  %v2403_v26 = vmax.f32 %v2399_v22, 0.0 }
 0x4d3   : > { %v2398_v36 = vadd.f32 %v2776_v8, %v2381_v24  ;;  %v2401_v39 = vmax.f32 %v2397_v30, 0.0 }
 0x4d4   : > { %v2404_v32 = vmax.f32 %v2400_v25, 0.0 }
 0x4d5   : > { %v2402_v40 = vmax.f32 %v2398_v36, 0.0 }
 0x4d6   : > { %v2789_v7 = vpack.c.bf16 %v2404_v32, %v2403_v26 }
 0x4d7   : > { %v2784_v41 = vpack.c.bf16 %v2402_v40, %v2401_v39 }
 0x4d8   : > { %2792 = vst [vmem:[%s510_s20 + $0x8] sm:$0xff] %v2789_v7  }
 0x4d9   : > { %2785 = vst [vmem:[%s510_s20] sm:$0xff] %v2784_v41  }
 0x4da   : > { %3749 = shalt.err (!%p3746_p11)
}
 0x4db   : > { %s3750_s2 = scalar_lea.hbm %s4702_s1, 256  ;;  %s3754_s25 = scalar_lea.hbm %s4874_s24, 1024 }
 0x4dc   : > { %p3751_p13 = scmp.ne.s32.totalorder %s4702_s1, %s3750_s2  ;;  %p3755_p8 = scmp.lt.u32.totalorder %s4702_s1, %s4874_s24 }
 0x4dd   : > { %p3756_p12 = scmp.lt.u32.totalorder %s3754_s25, %s3750_s2  ;;  %p3758_p0 = scmp.lt.u32.totalorder %s3750_s2, %s4702_s1 }
 0x4de   : > { %p3752_p4 = pnand %p3751_p13, %p4875_p3 }
 0x4df   : > { %p3757_p10 = por %p3756_p12, %p3755_p8 }
 0x4e0   : > { %p3753_p6 = pneg %p3752_p4 }
 0x4e1   : > { %p3759_p5 = por %p3758_p0, %p3757_p10 }
 0x4e3   : > { %p3760_p2 = pnand %p3759_p5, %p3753_p6 }
 0x4e5   : > { %3763 = shalt.err (!%p3760_p2)
}
 0x4e6   : > { %s3894_s15 = smov 64   ;;  %s3895_s14 = smov 4  }
 0x4e7   : > { %3202 = dma.vmem_to_hbm [thread:$0]  (%p4875_p3), %s4697_s28, 256, %s4702_s1, %s4706_s5, %s3894_s15, %s3894_s15, %s3895_s14  }
 0x4e8 PF: > { %s4876_s6 = sld [smem:[#allocation28_spill]]  ;;  %p3259_p9 = scmp.ge.s32.totalorder %s3878_s23, 2 }
 0x4e9   : > { %p4877_p7 = scmp.ne.s32.totalorder %s4836_s4, 0 }
 0x4eb   : > { %p3237_p1 = pnand %p3259_p9, %p4877_p7 }
 0x4ee   : > { %s2456_s16 = sand.u32 1, %s4876_s6  }
 0x4ef   : > { %s2457_s19 = scalar_lea.sflag [#allocation5], %s2456_s16 }
 0x4f0   : > { %3833 = dma.done.wait (!%p3237_p1), %s2457_s19, 256  }
 0x4f1   : > { %3835 = vsyncadd (!%p3237_p1), %s2457_s19, 4294967040  ;;  %s31_s23 = sadd.s32 1, %s3878_s23   ;;  %s4878_s13 = sld [smem:[#allocation29_spill]] }
 0x4f2   : > { %p28_p11 = scmp.ge.s32.totalorder %s31_s23, 6   ;;  %s4879_s14 = sld [smem:[#allocation30_spill]] }
 0x4f3   : > { %s4880_s15 = smov %s4895_s11  ;;  %s4881_s16 = smov %s3854_s17 }
 0x4f4   : > { %s4882_s17 = smov %s3858_s18  ;;  %s4883_s18 = smov %s4262_s0 }
 0x4f5   : > { %s4884_s19 = smov %s3870_s21  ;;  %s4885_s20 = smov %s3874_s22 }
 0x4f6   : > { %s4886_s21 = smov %s4889_s29  ;;  %s4887_s22 = smov %s4893_s26 }
 0x4f7   :  { %30 = sbr.rel (!%p28_p11) target bundleno = 23 (0x17), region = 151 }
 0x4fe   :  { %2462 = vsyncpa [#allocation4], 1 }
 0x4ff   :  { %2464 = vsyncpa [#allocation4 + $0x1], 1 }
 0x500   :  { %2465 = vsyncpa [#allocation7], 1 }
 0x501   :  { %2466 = vsyncpa [#allocation10], 1 }
 0x502   :  { %2467 = vsyncpa [#allocation13], 1 }
 0x503   :  { %2468 = vsyncpa [#allocation16], 1 }
 0x504   :  { %2469 = vsyncpa [#allocation19], 1 }
 0x505   :  { %2470 = vsyncpa [#allocation5], 1 }
 0x506   :  { %2472 = vsyncpa [#allocation5 + $0x1], 1 }

</bundles_post_ra>
